<compile_context>
chip_gen: v7x
topology: tpu7x:2x2x1
jax: 0.10.0
libtpu: 0.0.40
codegen_flags: <defaults>
</compile_context>

<pallas_src>
import functools

import jax
import jax.numpy as jnp
from jax.experimental import pallas as pl
from jax.experimental.pallas import tpu as pltpu

INPUT_SIZE = 784
HIDDEN_SIZE = 392
OUTPUT_SIZE = 10

HIDDEN_PAD = 512   # 392 -> 4 * 128 (lane-aligned contraction dim for layer 2)


def _round_up(x, m):
    return ((x + m - 1) // m) * m


def _mlp_kernel(x_ref, w1_ref, b1_ref, w2_ref, b2_ref, o_ref):
    # Cast the streamed x tile to the MXU dtype in-kernel (no wrapper-side
    # materialized copy of x).  No-op on the pure-f32 path.
    x = x_ref[...].astype(w1_ref.dtype)
    # Layer 1: MXU matmul, f32 accumulation.
    h = jnp.dot(x, w1_ref[...], preferred_element_type=jnp.float32)
    # Bias add + ReLU in f32 on the VPU (portable across v5e/v6e/v7x).
    h = jnp.maximum(h + b1_ref[...], 0.0)
    # Layer 2: cast activations to the weight dtype for the MXU, accumulate f32.
    o = jnp.dot(h.astype(w2_ref.dtype), w2_ref[...],
                preferred_element_type=jnp.float32)
    o_ref[...] = (o + b2_ref[...]).astype(o_ref.dtype)


@functools.partial(jax.jit, static_argnames=("block_batch", "use_bf16"))
def neural_net_forward(x, w1, b1, w2, b2, *, block_batch=1024, use_bf16=True):
    """Forward pass of NeuralNet.

    Args:
      x:  (B, 784) float32
      w1: (784, 392) float32   (transposed PyTorch l1.weight)
      b1: (392,)     float32
      w2: (392, 10)  float32   (transposed PyTorch l2.weight)
      b2: (10,)      float32
      block_batch: batch tile size (rounded to a multiple of 8).
      use_bf16: feed the MXU in bf16 (f32 accumulation).  Small numeric delta
        vs the pure-f32 PyTorch reference; set False for bit-closer results.
    Returns:
      (B, 10) float32 logits.
    """
    B = x.shape[0]
    mxu_dtype = jnp.bfloat16 if use_bf16 else jnp.float32

    # Batch tile: multiple of 8 sublanes, capped at block_batch.
    tb = min(_round_up(block_batch, 8), _round_up(B, 8))
    # v7x megacore: ensure >= 2 grid steps when the batch is big enough so the
    # "parallel" batch axis can be sharded across both TensorCores.
    if B >= 16 and pl.cdiv(B, tb) < 2:
        tb = _round_up(pl.cdiv(B, 2), 8)
    grid = (pl.cdiv(B, tb),)

    # Pad weights only on the hidden dim (tiny one-time cost); x and the
    # output stay at their logical shapes.
    w1_p = jnp.pad(w1, ((0, 0), (0, HIDDEN_PAD - HIDDEN_SIZE))).astype(mxu_dtype)
    w2_p = jnp.pad(w2, ((0, HIDDEN_PAD - HIDDEN_SIZE), (0, 0))).astype(mxu_dtype)
    b1_p = jnp.pad(b1, (0, HIDDEN_PAD - HIDDEN_SIZE)).reshape(1, HIDDEN_PAD)
    b2_p = b2.reshape(1, OUTPUT_SIZE)

    w_bytes = 2 if use_bf16 else 4
    cost = pl.CostEstimate(
        flops=2 * B * (INPUT_SIZE * HIDDEN_SIZE + HIDDEN_SIZE * OUTPUT_SIZE),
        transcendentals=0,
        bytes_accessed=(B * INPUT_SIZE * 4                      # x stream (f32)
                        + INPUT_SIZE * HIDDEN_PAD * w_bytes     # w1
                        + HIDDEN_PAD * OUTPUT_SIZE * w_bytes    # w2
                        + (HIDDEN_PAD + OUTPUT_SIZE) * 4        # biases
                        + B * OUTPUT_SIZE * 4),                 # logits out
    )

    return pl.pallas_call(
        _mlp_kernel,
        out_shape=jax.ShapeDtypeStruct((B, OUTPUT_SIZE), jnp.float32),
        grid=grid,
        in_specs=[
            # Streamed, double-buffered per batch tile; 784 == full last dim.
            pl.BlockSpec((tb, INPUT_SIZE), lambda i: (i, 0)),
            # Weights / biases: same block every step -> VMEM-resident.
            pl.BlockSpec((INPUT_SIZE, HIDDEN_PAD), lambda i: (0, 0)),
            pl.BlockSpec((1, HIDDEN_PAD), lambda i: (0, 0)),
            pl.BlockSpec((HIDDEN_PAD, OUTPUT_SIZE), lambda i: (0, 0)),
            pl.BlockSpec((1, OUTPUT_SIZE), lambda i: (0, 0)),
        ],
        # Narrow logits writeback: (tb, 10) block (10 == full last dim).
        out_specs=pl.BlockSpec((tb, OUTPUT_SIZE), lambda i: (i, 0)),
        compiler_params=pltpu.CompilerParams(
            dimension_semantics=("parallel",),   # batch tiles are independent
            vmem_limit_bytes=32 * 1024 * 1024,   # v7x-safe; ample for tb=1024
        ),
        cost_estimate=cost,
    )(x, w1_p, b1_p, w2_p, b2_p)


def init_params(key):
    """Deterministic parameter init mimicking nn.Linear's U(-1/sqrt(fan_in), +)."""
    k1, k2, k3, k4 = jax.random.split(key, 4)
    bound1 = 1.0 / jnp.sqrt(jnp.float32(INPUT_SIZE))
    bound2 = 1.0 / jnp.sqrt(jnp.float32(HIDDEN_SIZE))
    # Stored pre-transposed: (in, out)
    w1 = jax.random.uniform(k1, (INPUT_SIZE, HIDDEN_SIZE), jnp.float32,
                            minval=-bound1, maxval=bound1)
    b1 = jax.random.uniform(k2, (HIDDEN_SIZE,), jnp.float32,
                            minval=-bound1, maxval=bound1)
    w2 = jax.random.uniform(k3, (HIDDEN_SIZE, OUTPUT_SIZE), jnp.float32,
                            minval=-bound2, maxval=bound2)
    b2 = jax.random.uniform(k4, (OUTPUT_SIZE,), jnp.float32,
                            minval=-bound2, maxval=bound2)
    return w1, b1, w2, b2


def reference_forward(x, w1, b1, w2, b2):
    h = jnp.maximum(x @ w1 + b1, 0.0)
    return h @ w2 + b2


if __name__ == "__main__":
    key = jax.random.PRNGKey(0)
    k_params, k_x = jax.random.split(key)
    w1, b1, w2, b2 = init_params(k_params)

    batch = 8
    x = jax.random.normal(k_x, (batch, INPUT_SIZE), jnp.float32)
    ref = reference_forward(x, w1, b1, w2, b2)

    # f32 path: numerically matches the PyTorch reference tightly.
    out_f32 = jax.block_until_ready(
        neural_net_forward(x, w1, b1, w2, b2, use_bf16=False))
    assert out_f32.shape == (batch, OUTPUT_SIZE)
    assert jnp.allclose(out_f32, ref, atol=1e-4, rtol=1e-4)

    # bf16-MXU path (default): f32 accumulation, small quantization delta.
    out_bf16 = jax.block_until_ready(
        neural_net_forward(x, w1, b1, w2, b2, use_bf16=True))
    assert out_bf16.shape == (batch, OUTPUT_SIZE)
    assert jnp.allclose(out_bf16, ref, atol=5e-2, rtol=5e-2)

    # Multi-tile path with a non-divisible tail block (no wrapper batch pad):
    # grid=(3,), last block covers rows 16..19 only.
    batch2 = 20
    x2 = jax.random.normal(jax.random.PRNGKey(1), (batch2, INPUT_SIZE),
                           jnp.float32)
    ref2 = reference_forward(x2, w1, b1, w2, b2)
    out2 = jax.block_until_ready(
        neural_net_forward(x2, w1, b1, w2, b2, block_batch=8, use_bf16=False))
    assert out2.shape == (batch2, OUTPUT_SIZE)
    assert jnp.allclose(out2, ref2, atol=1e-4, rtol=1e-4)

    print("KERNEL_OK")
</pallas_src>

<mosaic_0001>
module attributes {stable_mosaic.version = 11 : i64} {
  func.func @_mlp_kernel(%arg0: i32, %arg1: memref<8x784xf32, #tpu.memory_space<vmem>>, %arg2: memref<784x512xf32, #tpu.memory_space<vmem>>, %arg3: memref<1x512xf32, #tpu.memory_space<vmem>>, %arg4: memref<512x10xf32, #tpu.memory_space<vmem>>, %arg5: memref<1x10xf32, #tpu.memory_space<vmem>>, %arg6: memref<8x10xf32, #tpu.memory_space<vmem>>) attributes {dimension_semantics = [#tpu.dimension_semantics<parallel>], iteration_bounds = array<i64: 1>, scalar_prefetch = 0 : i64, scratch_operands = 0 : i64, tpu.core_type = #tpu.core_type<tc>, window_params = [{transform_indices = @transform_0, window_bounds = array<i64: 8, 784>}, {pipeline_mode = #tpu.pipeline_mode<synchronous>, transform_indices = @transform_1, window_bounds = array<i64: 784, 512>}, {pipeline_mode = #tpu.pipeline_mode<synchronous>, transform_indices = @transform_2, window_bounds = array<i64: 1, 512>}, {pipeline_mode = #tpu.pipeline_mode<synchronous>, transform_indices = @transform_3, window_bounds = array<i64: 512, 10>}, {pipeline_mode = #tpu.pipeline_mode<synchronous>, transform_indices = @transform_4, window_bounds = array<i64: 1, 10>}, {transform_indices = @transform_5, window_bounds = array<i64: 8, 10>}]} {
    %c0 = arith.constant 0 : index
    %c0_0 = arith.constant 0 : index
    %0 = vector.load %arg1[%c0, %c0_0] : memref<8x784xf32, #tpu.memory_space<vmem>>, vector<8x784xf32>
    %c0_1 = arith.constant 0 : index
    %c0_2 = arith.constant 0 : index
    %1 = vector.load %arg2[%c0_1, %c0_2] : memref<784x512xf32, #tpu.memory_space<vmem>>, vector<784x512xf32>
    %cst = arith.constant dense<0.000000e+00> : vector<8x512xf32>
    %2 = tpu.matmul %0, %1, %cst {dimension_numbers = #tpu.dot_dimension_numbers<[1], [0], [0], [1], [0, 0, 1, 1], [], []>} : vector<8x784xf32>, vector<784x512xf32>, vector<8x512xf32> -> vector<8x512xf32>
    %c0_3 = arith.constant 0 : index
    %c0_4 = arith.constant 0 : index
    %3 = vector.load %arg3[%c0_3, %c0_4] : memref<1x512xf32, #tpu.memory_space<vmem>>, vector<1x512xf32>
    %4 = vector.broadcast %3 : vector<1x512xf32> to vector<8x512xf32>
    %5 = arith.addf %2, %4 : vector<8x512xf32>
    %cst_5 = arith.constant 0.000000e+00 : f32
    %6 = vector.broadcast %cst_5 : f32 to vector<8x512xf32>
    %7 = arith.maximumf %5, %6 : vector<8x512xf32>
    %c0_6 = arith.constant 0 : index
    %c0_7 = arith.constant 0 : index
    %8 = vector.load %arg4[%c0_6, %c0_7] : memref<512x10xf32, #tpu.memory_space<vmem>>, vector<512x10xf32>
    %cst_8 = arith.constant dense<0.000000e+00> : vector<8x10xf32>
    %9 = tpu.matmul %7, %8, %cst_8 {dimension_numbers = #tpu.dot_dimension_numbers<[1], [0], [0], [1], [0, 0, 1, 1], [], []>} : vector<8x512xf32>, vector<512x10xf32>, vector<8x10xf32> -> vector<8x10xf32>
    %c0_9 = arith.constant 0 : index
    %c0_10 = arith.constant 0 : index
    %10 = vector.load %arg5[%c0_9, %c0_10] : memref<1x10xf32, #tpu.memory_space<vmem>>, vector<1x10xf32>
    %11 = vector.broadcast %10 : vector<1x10xf32> to vector<8x10xf32>
    %12 = arith.addf %9, %11 : vector<8x10xf32>
    %c0_11 = arith.constant 0 : index
    %c0_12 = arith.constant 0 : index
    %13 = vector.load %arg6[%c0_11, %c0_12] : memref<8x10xf32, #tpu.memory_space<vmem>>, vector<8x10xf32>
    tpu.vector_store %arg6[%c0_11, %c0_12], %12 {strides = array<i32>} : memref<8x10xf32, #tpu.memory_space<vmem>>, vector<8x10xf32>,
    return
  }
  func.func @transform_0(%arg0: i32) -> (i32, i32) {
    %c0_i32 = arith.constant 0 : i32
    %c0_i32_0 = arith.constant 0 : i32
    return %arg0, %c0_i32 : i32, i32
  }
  func.func @transform_1(%arg0: i32) -> (i32, i32) {
    %c0_i32 = arith.constant 0 : i32
    %c0_i32_0 = arith.constant 0 : i32
    %c0_i32_1 = arith.constant 0 : i32
    return %c0_i32, %c0_i32_0 : i32, i32
  }
  func.func @transform_2(%arg0: i32) -> (i32, i32) {
    %c0_i32 = arith.constant 0 : i32
    %c0_i32_0 = arith.constant 0 : i32
    %c0_i32_1 = arith.constant 0 : i32
    return %c0_i32, %c0_i32_0 : i32, i32
  }
  func.func @transform_3(%arg0: i32) -> (i32, i32) {
    %c0_i32 = arith.constant 0 : i32
    %c0_i32_0 = arith.constant 0 : i32
    %c0_i32_1 = arith.constant 0 : i32
    return %c0_i32, %c0_i32_0 : i32, i32
  }
  func.func @transform_4(%arg0: i32) -> (i32, i32) {
    %c0_i32 = arith.constant 0 : i32
    %c0_i32_0 = arith.constant 0 : i32
    %c0_i32_1 = arith.constant 0 : i32
    return %c0_i32, %c0_i32_0 : i32, i32
  }
  func.func @transform_5(%arg0: i32) -> (i32, i32) {
    %c0_i32 = arith.constant 0 : i32
    %c0_i32_0 = arith.constant 0 : i32
    return %arg0, %c0_i32 : i32, i32
  }
}

</mosaic_0001>

<bundles_post_ra>
// kernel: neural_net_forward.1
= control target key start
LH: loop header
LB: loop body
LE: loop exit
PB: predicated region body
PF: predicated region fallthrough
CT: control target
= control target key end

     0   :  { %s3255_s0 = inlined_call_operand.vmem [shape: f32[8,784], index: 0, kind: input, shape index: {}]   ;;  %s3256_s1 = inlined_call_operand.vmem [shape: f32[784,512], index: 1, kind: input, shape index: {}]   ;;  %s3257_s2 = inlined_call_operand.vmem [shape: f32[1,512], index: 2, kind: input, shape index: {}]   ;;  %s3258_s3 = inlined_call_operand.vmem [shape: f32[512,10], index: 3, kind: input, shape index: {}]   ;;  %s3259_s4 = inlined_call_operand.vmem [shape: f32[1,10], index: 4, kind: input, shape index: {}]   ;;  %s3260_s5 = inlined_call_operand.hbm [shape: f32[8,10], index: 5, kind: output, shape index: {}]  }
   0x1   :  { %v29_v0 = vld [vmem:[%s3256_s1 + $0x8] sm:$0xff]  ;;  %v31_v2 = vld [vmem:[%s3256_s1 + $0x18] sm:$0xff]  ;;  %v28_v5 = vld [vmem:[%s3256_s1] sm:$0xff] }
   0x2   :  { %v33_v1 = vld [vmem:[%s3256_s1 + $0x28] sm:$0xff]  ;;  %v35_v4 = vld [vmem:[%s3256_s1 + $0x38] sm:$0xff]  ;;  %v32_v6 = vld [vmem:[%s3256_s1 + $0x20] sm:$0xff] }
   0x3   :  { %v1318_v3 = vpack.c.bf16 %v33_v1, %v29_v0  ;;  %v1514_v7 = vpack.c.bf16 %v35_v4, %v31_v2  ;;  %v1320_v8 = vpack.c.bf16 %v32_v6, %v28_v5  ;;  %v30_v9 = vld [vmem:[%s3256_s1 + $0x10] sm:$0xff]  ;;  %v37_v11 = vld [vmem:[%s3256_s1 + $0x48] sm:$0xff]  ;;  %v39_v14 = vld [vmem:[%s3256_s1 + $0x58] sm:$0xff] }
   0x4   :  { %v34_v10 = vld [vmem:[%s3256_s1 + $0x30] sm:$0xff]  ;;  %v41_v13 = vld [vmem:[%s3256_s1 + $0x68] sm:$0xff]  ;;  %v43_v15 = vld [vmem:[%s3256_s1 + $0x78] sm:$0xff] }
   0x5   :  { %1319 = vmatprep.subr.bf16.mxu0 %v1318_v3  ;;  %v1516_v12 = vpack.c.bf16 %v34_v10, %v30_v9  ;;  %1515 = vmatprep.subr.bf16.mxu1 %v1514_v7  ;;  %v1322_v16 = vpack.c.bf16 %v41_v13, %v37_v11  ;;  %v1518_v17 = vpack.c.bf16 %v43_v15, %v39_v14  ;;  %v36_v18 = vld [vmem:[%s3256_s1 + $0x40] sm:$0xff]  ;;  %v38_v20 = vld [vmem:[%s3256_s1 + $0x50] sm:$0xff]  ;;  %v45_v23 = vld [vmem:[%s3256_s1 + $0x88] sm:$0xff] }
   0x6   :  { %1321 = vmatpush1.bf16.msra.mxu0 %v1320_v8  ;;  %v40_v19 = vld [vmem:[%s3256_s1 + $0x60] sm:$0xff]  ;;  %v42_v22 = vld [vmem:[%s3256_s1 + $0x70] sm:$0xff]  ;;  %v49_v24 = vld [vmem:[%s3256_s1 + $0xa8] sm:$0xff] }
   0x7   :  { %1517 = vmatpush1.bf16.msra.mxu1 %v1516_v12  ;;  %v1324_v21 = vpack.c.bf16 %v40_v19, %v36_v18  ;;  %1323 = vmatprep.subr.bf16.mxu0 %v1322_v16  ;;  %v1520_v25 = vpack.c.bf16 %v42_v22, %v38_v20  ;;  %v1326_v26 = vpack.c.bf16 %v49_v24, %v45_v23  ;;  %v47_v27 = vld [vmem:[%s3256_s1 + $0x98] sm:$0xff]  ;;  %v44_v29 = vld [vmem:[%s3256_s1 + $0x80] sm:$0xff]  ;;  %v46_v32 = vld [vmem:[%s3256_s1 + $0x90] sm:$0xff] }
   0x8   :  { %1519 = vmatprep.subr.bf16.mxu1 %v1518_v17  ;;  %v51_v28 = vld [vmem:[%s3256_s1 + $0xb8] sm:$0xff]  ;;  %v48_v31 = vld [vmem:[%s3256_s1 + $0xa0] sm:$0xff]  ;;  %v50_v33 = vld [vmem:[%s3256_s1 + $0xb0] sm:$0xff] }
   0x9   :  { %v1522_v30 = vpack.c.bf16 %v51_v28, %v47_v27  ;;  %v1328_v34 = vpack.c.bf16 %v48_v31, %v44_v29  ;;  %v53_v35 = vld [vmem:[%s3256_s1 + $0xc8] sm:$0xff]  ;;  %v55_v37 = vld [vmem:[%s3256_s1 + $0xd8] sm:$0xff]  ;;  %v1524_v38 = vpack.c.bf16 %v50_v33, %v46_v32  ;;  %v52_v41 = vld [vmem:[%s3256_s1 + $0xc0] sm:$0xff] }
   0xa   :  { %1325 = vmatpush1.bf16.msra.mxu0 %v1324_v21  ;;  %v57_v36 = vld [vmem:[%s3256_s1 + $0xe8] sm:$0xff]  ;;  %v59_v40 = vld [vmem:[%s3256_s1 + $0xf8] sm:$0xff]  ;;  %v56_v42 = vld [vmem:[%s3256_s1 + $0xe0] sm:$0xff] }
   0xb   :  { %1521 = vmatpush1.bf16.msra.mxu1 %v1520_v25  ;;  %1327 = vmatprep.subr.bf16.mxu0 %v1326_v26  ;;  %v1330_v39 = vpack.c.bf16 %v57_v36, %v53_v35  ;;  %v1526_v43 = vpack.c.bf16 %v59_v40, %v55_v37  ;;  %v54_v44 = vld [vmem:[%s3256_s1 + $0xd0] sm:$0xff]  ;;  %v61_v46 = vld [vmem:[%s3256_s1 + $0x108] sm:$0xff]  ;;  %v63_v48 = vld [vmem:[%s3256_s1 + $0x118] sm:$0xff]  ;;  %v1332_v50 = vpack.c.bf16 %v56_v42, %v52_v41 }
   0xc   :  { %1523 = vmatprep.subr.bf16.mxu1 %v1522_v30  ;;  %v58_v45 = vld [vmem:[%s3256_s1 + $0xf0] sm:$0xff]  ;;  %v65_v47 = vld [vmem:[%s3256_s1 + $0x128] sm:$0xff]  ;;  %v67_v49 = vld [vmem:[%s3256_s1 + $0x138] sm:$0xff] }
   0xd   :  { %v1528_v51 = vpack.c.bf16 %v58_v45, %v54_v44  ;;  %v1334_v52 = vpack.c.bf16 %v65_v47, %v61_v46  ;;  %v60_v53 = vld [vmem:[%s3256_s1 + $0x100] sm:$0xff]  ;;  %v62_v55 = vld [vmem:[%s3256_s1 + $0x110] sm:$0xff]  ;;  %v1530_v56 = vpack.c.bf16 %v67_v49, %v63_v48  ;;  %v69_v58 = vld [vmem:[%s3256_s1 + $0x148] sm:$0xff] }
   0xe   :  { %1329 = vmatpush1.bf16.msra.mxu0 %v1328_v34  ;;  %v64_v54 = vld [vmem:[%s3256_s1 + $0x120] sm:$0xff]  ;;  %v66_v57 = vld [vmem:[%s3256_s1 + $0x130] sm:$0xff]  ;;  %v73_v59 = vld [vmem:[%s3256_s1 + $0x168] sm:$0xff] }
   0xf   :  { %1525 = vmatpush1.bf16.msra.mxu1 %v1524_v38  ;;  %1331 = vmatprep.subr.bf16.mxu0 %v1330_v39  ;;  %v71_v60 = vld [vmem:[%s3256_s1 + $0x158] sm:$0xff]  ;;  %v1336_v62 = vpack.c.bf16 %v64_v54, %v60_v53  ;;  %v1532_v63 = vpack.c.bf16 %v66_v57, %v62_v55  ;;  %v1338_v0 = vpack.c.bf16 %v73_v59, %v69_v58  ;;  %v68_v1 = vld [vmem:[%s3256_s1 + $0x140] sm:$0xff]  ;;  %v70_v3 = vld [vmem:[%s3256_s1 + $0x150] sm:$0xff] }
  0x10   :  { %1527 = vmatprep.subr.bf16.mxu1 %v1526_v43  ;;  %v75_v61 = vld [vmem:[%s3256_s1 + $0x178] sm:$0xff]  ;;  %v72_v2 = vld [vmem:[%s3256_s1 + $0x160] sm:$0xff]  ;;  %v74_v5 = vld [vmem:[%s3256_s1 + $0x170] sm:$0xff] }
  0x11   :  { %v1534_v4 = vpack.c.bf16 %v75_v61, %v71_v60  ;;  %v77_v6 = vld [vmem:[%s3256_s1 + $0x188] sm:$0xff]  ;;  %v79_v8 = vld [vmem:[%s3256_s1 + $0x198] sm:$0xff]  ;;  %v1340_v10 = vpack.c.bf16 %v72_v2, %v68_v1  ;;  %v1536_v11 = vpack.c.bf16 %v74_v5, %v70_v3  ;;  %v76_v13 = vld [vmem:[%s3256_s1 + $0x180] sm:$0xff] }
  0x12   :  { %1333 = vmatpush1.bf16.msra.mxu0 %v1332_v50  ;;  %v81_v7 = vld [vmem:[%s3256_s1 + $0x1a8] sm:$0xff]  ;;  %v83_v9 = vld [vmem:[%s3256_s1 + $0x1b8] sm:$0xff]  ;;  %v80_v14 = vld [vmem:[%s3256_s1 + $0x1a0] sm:$0xff] }
  0x13   :  { %1529 = vmatpush1.bf16.msra.mxu1 %v1528_v51  ;;  %1335 = vmatprep.subr.bf16.mxu0 %v1334_v52  ;;  %v1342_v12 = vpack.c.bf16 %v81_v7, %v77_v6  ;;  %v78_v15 = vld [vmem:[%s3256_s1 + $0x190] sm:$0xff]  ;;  %v1538_v16 = vpack.c.bf16 %v83_v9, %v79_v8  ;;  %v85_v18 = vld [vmem:[%s3256_s1 + $0x1c8] sm:$0xff]  ;;  %v87_v20 = vld [vmem:[%s3256_s1 + $0x1d8] sm:$0xff]  ;;  %v1344_v22 = vpack.c.bf16 %v80_v14, %v76_v13 }
  0x14   :  { %1531 = vmatprep.subr.bf16.mxu1 %v1530_v56  ;;  %v82_v17 = vld [vmem:[%s3256_s1 + $0x1b0] sm:$0xff]  ;;  %v89_v19 = vld [vmem:[%s3256_s1 + $0x1e8] sm:$0xff]  ;;  %v91_v21 = vld [vmem:[%s3256_s1 + $0x1f8] sm:$0xff] }
  0x15   :  { %v1540_v23 = vpack.c.bf16 %v82_v17, %v78_v15  ;;  %v1346_v24 = vpack.c.bf16 %v89_v19, %v85_v18  ;;  %v84_v25 = vld [vmem:[%s3256_s1 + $0x1c0] sm:$0xff]  ;;  %v86_v27 = vld [vmem:[%s3256_s1 + $0x1d0] sm:$0xff]  ;;  %v1542_v28 = vpack.c.bf16 %v91_v21, %v87_v20  ;;  %v93_v30 = vld [vmem:[%s3256_s1 + $0x208] sm:$0xff] }
  0x16   :  { %1337 = vmatpush1.bf16.msra.mxu0 %v1336_v62  ;;  %v88_v26 = vld [vmem:[%s3256_s1 + $0x1e0] sm:$0xff]  ;;  %v90_v29 = vld [vmem:[%s3256_s1 + $0x1f0] sm:$0xff]  ;;  %v97_v31 = vld [vmem:[%s3256_s1 + $0x228] sm:$0xff] }
  0x17   :  { %1533 = vmatpush1.bf16.msra.mxu1 %v1532_v63  ;;  %1339 = vmatprep.subr.bf16.mxu0 %v1338_v0  ;;  %v95_v32 = vld [vmem:[%s3256_s1 + $0x218] sm:$0xff]  ;;  %v1348_v34 = vpack.c.bf16 %v88_v26, %v84_v25  ;;  %v1544_v35 = vpack.c.bf16 %v90_v29, %v86_v27  ;;  %v1350_v36 = vpack.c.bf16 %v97_v31, %v93_v30  ;;  %v92_v37 = vld [vmem:[%s3256_s1 + $0x200] sm:$0xff]  ;;  %v94_v39 = vld [vmem:[%s3256_s1 + $0x210] sm:$0xff] }
  0x18   :  { %1535 = vmatprep.subr.bf16.mxu1 %v1534_v4  ;;  %v99_v33 = vld [vmem:[%s3256_s1 + $0x238] sm:$0xff]  ;;  %v96_v38 = vld [vmem:[%s3256_s1 + $0x220] sm:$0xff]  ;;  %v98_v41 = vld [vmem:[%s3256_s1 + $0x230] sm:$0xff] }
  0x19   :  { %v1546_v40 = vpack.c.bf16 %v99_v33, %v95_v32  ;;  %v101_v42 = vld [vmem:[%s3256_s1 + $0x248] sm:$0xff]  ;;  %v103_v44 = vld [vmem:[%s3256_s1 + $0x258] sm:$0xff]  ;;  %v1352_v46 = vpack.c.bf16 %v96_v38, %v92_v37  ;;  %v1548_v47 = vpack.c.bf16 %v98_v41, %v94_v39  ;;  %v100_v49 = vld [vmem:[%s3256_s1 + $0x240] sm:$0xff] }
  0x1a   :  { %1341 = vmatpush1.bf16.msra.mxu0 %v1340_v10  ;;  %v105_v43 = vld [vmem:[%s3256_s1 + $0x268] sm:$0xff]  ;;  %v107_v45 = vld [vmem:[%s3256_s1 + $0x278] sm:$0xff]  ;;  %v104_v50 = vld [vmem:[%s3256_s1 + $0x260] sm:$0xff] }
  0x1b   :  { %1537 = vmatpush1.bf16.msra.mxu1 %v1536_v11  ;;  %1343 = vmatprep.subr.bf16.mxu0 %v1342_v12  ;;  %v1354_v48 = vpack.c.bf16 %v105_v43, %v101_v42  ;;  %v102_v51 = vld [vmem:[%s3256_s1 + $0x250] sm:$0xff]  ;;  %v1550_v52 = vpack.c.bf16 %v107_v45, %v103_v44  ;;  %v109_v54 = vld [vmem:[%s3256_s1 + $0x288] sm:$0xff]  ;;  %v111_v56 = vld [vmem:[%s3256_s1 + $0x298] sm:$0xff]  ;;  %v1356_v58 = vpack.c.bf16 %v104_v50, %v100_v49 }
  0x1c   :  { %1539 = vmatprep.subr.bf16.mxu1 %v1538_v16  ;;  %v106_v53 = vld [vmem:[%s3256_s1 + $0x270] sm:$0xff]  ;;  %v113_v55 = vld [vmem:[%s3256_s1 + $0x2a8] sm:$0xff]  ;;  %v115_v57 = vld [vmem:[%s3256_s1 + $0x2b8] sm:$0xff] }
  0x1d   :  { %v1552_v59 = vpack.c.bf16 %v106_v53, %v102_v51  ;;  %v1358_v60 = vpack.c.bf16 %v113_v55, %v109_v54  ;;  %v108_v61 = vld [vmem:[%s3256_s1 + $0x280] sm:$0xff]  ;;  %v110_v63 = vld [vmem:[%s3256_s1 + $0x290] sm:$0xff]  ;;  %v1554_v0 = vpack.c.bf16 %v115_v57, %v111_v56  ;;  %v117_v2 = vld [vmem:[%s3256_s1 + $0x2c8] sm:$0xff] }
  0x1e   :  { %1345 = vmatpush1.bf16.msra.mxu0 %v1344_v22  ;;  %v112_v62 = vld [vmem:[%s3256_s1 + $0x2a0] sm:$0xff]  ;;  %v114_v1 = vld [vmem:[%s3256_s1 + $0x2b0] sm:$0xff]  ;;  %v121_v3 = vld [vmem:[%s3256_s1 + $0x2e8] sm:$0xff] }
  0x1f   :  { %1541 = vmatpush1.bf16.msra.mxu1 %v1540_v23  ;;  %1347 = vmatprep.subr.bf16.mxu0 %v1346_v24  ;;  %v119_v4 = vld [vmem:[%s3256_s1 + $0x2d8] sm:$0xff]  ;;  %v1360_v6 = vpack.c.bf16 %v112_v62, %v108_v61  ;;  %v116_v7 = vld [vmem:[%s3256_s1 + $0x2c0] sm:$0xff]  ;;  %v1556_v8 = vpack.c.bf16 %v114_v1, %v110_v63  ;;  %v1362_v9 = vpack.c.bf16 %v121_v3, %v117_v2  ;;  %v118_v11 = vld [vmem:[%s3256_s1 + $0x2d0] sm:$0xff] }
  0x20   :  { %1543 = vmatprep.subr.bf16.mxu1 %v1542_v28  ;;  %v123_v5 = vld [vmem:[%s3256_s1 + $0x2f8] sm:$0xff]  ;;  %v120_v10 = vld [vmem:[%s3256_s1 + $0x2e0] sm:$0xff]  ;;  %v122_v12 = vld [vmem:[%s3256_s1 + $0x2f0] sm:$0xff] }
  0x21   :  { %v1558_v13 = vpack.c.bf16 %v123_v5, %v119_v4  ;;  %v125_v14 = vld [vmem:[%s3256_s1 + $0x308] sm:$0xff]  ;;  %v127_v17 = vld [vmem:[%s3256_s1 + $0x318] sm:$0xff]  ;;  %v1364_v19 = vpack.c.bf16 %v120_v10, %v116_v7  ;;  %v1560_v20 = vpack.c.bf16 %v122_v12, %v118_v11  ;;  %v124_v22 = vld [vmem:[%s3256_s1 + $0x300] sm:$0xff] }
  0x22   :  { %1349 = vmatpush1.bf16.msra.mxu0 %v1348_v34  ;;  %v129_v15 = vld [vmem:[%s3256_s1 + $0x328] sm:$0xff]  ;;  %v131_v18 = vld [vmem:[%s3256_s1 + $0x338] sm:$0xff]  ;;  %v128_v23 = vld [vmem:[%s3256_s1 + $0x320] sm:$0xff] }
  0x23   :  { %1545 = vmatpush1.bf16.msra.mxu1 %v1544_v35  ;;  %1351 = vmatprep.subr.bf16.mxu0 %v1350_v36  ;;  %v22_v16 = vld [vmem:[%s3255_s0 + $0x8] sm:$0xff]  ;;  %v1366_v21 = vpack.c.bf16 %v129_v15, %v125_v14  ;;  %v126_v24 = vld [vmem:[%s3256_s1 + $0x310] sm:$0xff]  ;;  %v1562_v25 = vpack.c.bf16 %v131_v18, %v127_v17  ;;  %v135_v29 = vld [vmem:[%s3256_s1 + $0x358] sm:$0xff]  ;;  %v1368_v31 = vpack.c.bf16 %v128_v23, %v124_v22 }
  0x24   :  { %1547 = vmatprep.subr.bf16.mxu1 %v1546_v40  ;;  %510 = vmatprep.mubr.f32.mxu0 %v22_v16  ;;  %v130_v26 = vld [vmem:[%s3256_s1 + $0x330] sm:$0xff]  ;;  %v133_v27 = vld [vmem:[%s3256_s1 + $0x348] sm:$0xff]  ;;  %v139_v30 = vld [vmem:[%s3256_s1 + $0x378] sm:$0xff] }
  0x25   :  { %794 = vmatprep.mubr.f32.mxu1 %v22_v16  ;;  %v137_v28 = vld [vmem:[%s3256_s1 + $0x368] sm:$0xff]  ;;  %v1564_v32 = vpack.c.bf16 %v130_v26, %v126_v24  ;;  %v132_v34 = vld [vmem:[%s3256_s1 + $0x340] sm:$0xff]  ;;  %v134_v36 = vld [vmem:[%s3256_s1 + $0x350] sm:$0xff]  ;;  %v1566_v37 = vpack.c.bf16 %v139_v30, %v135_v29 }
  0x26   :  { %1353 = vmatpush1.bf16.msra.mxu0 %v1352_v46  ;;  %v1370_v33 = vpack.c.bf16 %v137_v28, %v133_v27  ;;  %v136_v35 = vld [vmem:[%s3256_s1 + $0x360] sm:$0xff]  ;;  %v138_v38 = vld [vmem:[%s3256_s1 + $0x370] sm:$0xff]  ;;  %v141_v39 = vld [vmem:[%s3256_s1 + $0x388] sm:$0xff] }
  0x27   :  { %1549 = vmatpush1.bf16.msra.mxu1 %v1548_v47  ;;  %1355 = vmatprep.subr.bf16.mxu0 %v1354_v48  ;;  %v145_v40 = vld [vmem:[%s3256_s1 + $0x3a8] sm:$0xff]  ;;  %v143_v41 = vld [vmem:[%s3256_s1 + $0x398] sm:$0xff]  ;;  %v1372_v43 = vpack.c.bf16 %v136_v35, %v132_v34  ;;  %v1568_v44 = vpack.c.bf16 %v138_v38, %v134_v36  ;;  %v140_v46 = vld [vmem:[%s3256_s1 + $0x380] sm:$0xff] }
  0x28   :  { %1551 = vmatprep.subr.bf16.mxu1 %v1550_v52  ;;  %v147_v42 = vld [vmem:[%s3256_s1 + $0x3b8] sm:$0xff]  ;;  %v1374_v45 = vpack.c.bf16 %v145_v40, %v141_v39  ;;  %v144_v47 = vld [vmem:[%s3256_s1 + $0x3a0] sm:$0xff]  ;;  %v142_v48 = vld [vmem:[%s3256_s1 + $0x390] sm:$0xff] }
  0x29   :  { %v1570_v49 = vpack.c.bf16 %v147_v42, %v143_v41  ;;  %v146_v50 = vld [vmem:[%s3256_s1 + $0x3b0] sm:$0xff]  ;;  %v149_v51 = vld [vmem:[%s3256_s1 + $0x3c8] sm:$0xff]  ;;  %v151_v53 = vld [vmem:[%s3256_s1 + $0x3d8] sm:$0xff]  ;;  %v1376_v55 = vpack.c.bf16 %v144_v47, %v140_v46 }
  0x2a   :  { %1357 = vmatpush1.bf16.msra.mxu0 %v1356_v58  ;;  %v153_v52 = vld [vmem:[%s3256_s1 + $0x3e8] sm:$0xff]  ;;  %v155_v54 = vld [vmem:[%s3256_s1 + $0x3f8] sm:$0xff]  ;;  %v1572_v56 = vpack.c.bf16 %v146_v50, %v142_v48  ;;  %v148_v58 = vld [vmem:[%s3256_s1 + $0x3c0] sm:$0xff] }
  0x2b   :  { %1553 = vmatpush1.bf16.msra.mxu1 %v1552_v59  ;;  %1359 = vmatprep.subr.bf16.mxu0 %v1358_v60  ;;  %v1378_v57 = vpack.c.bf16 %v153_v52, %v149_v51  ;;  %v152_v59 = vld [vmem:[%s3256_s1 + $0x3e0] sm:$0xff]  ;;  %v150_v60 = vld [vmem:[%s3256_s1 + $0x3d0] sm:$0xff]  ;;  %v1574_v61 = vpack.c.bf16 %v155_v54, %v151_v53  ;;  %v157_v63 = vld [vmem:[%s3256_s1 + $0x408] sm:$0xff] }
  0x2c   :  { %1555 = vmatprep.subr.bf16.mxu1 %v1554_v0  ;;  %v154_v62 = vld [vmem:[%s3256_s1 + $0x3f0] sm:$0xff]  ;;  %v161_v0 = vld [vmem:[%s3256_s1 + $0x428] sm:$0xff]  ;;  %v159_v1 = vld [vmem:[%s3256_s1 + $0x418] sm:$0xff]  ;;  %v1380_v3 = vpack.c.bf16 %v152_v59, %v148_v58 }
  0x2d   :  { %v163_v2 = vld [vmem:[%s3256_s1 + $0x438] sm:$0xff]  ;;  %v1576_v4 = vpack.c.bf16 %v154_v62, %v150_v60  ;;  %v1382_v5 = vpack.c.bf16 %v161_v0, %v157_v63  ;;  %v160_v7 = vld [vmem:[%s3256_s1 + $0x420] sm:$0xff]  ;;  %v162_v10 = vld [vmem:[%s3256_s1 + $0x430] sm:$0xff] }
  0x2e   :  { %1361 = vmatpush1.bf16.msra.mxu0 %v1360_v6  ;;  %v156_v6 = vld [vmem:[%s3256_s1 + $0x400] sm:$0xff]  ;;  %v165_v11 = vld [vmem:[%s3256_s1 + $0x448] sm:$0xff]  ;;  %v171_v14 = vld [vmem:[%s3256_s1 + $0x478] sm:$0xff] }
  0x2f   :  { %1557 = vmatpush1.bf16.msra.mxu1 %v1556_v8  ;;  %1363 = vmatprep.subr.bf16.mxu0 %v1362_v9  ;;  %v158_v8 = vld [vmem:[%s3256_s1 + $0x410] sm:$0xff]  ;;  %v1578_v9 = vpack.c.bf16 %v163_v2, %v159_v1  ;;  %v169_v12 = vld [vmem:[%s3256_s1 + $0x468] sm:$0xff]  ;;  %v21_v15 = vld [vmem:[%s3255_s0] sm:$0xff]  ;;  %v1384_v16 = vpack.c.bf16 %v160_v7, %v156_v6 }
  0x30   :  { %1559 = vmatprep.subr.bf16.mxu1 %v1558_v13  ;;  %v167_v13 = vld [vmem:[%s3256_s1 + $0x458] sm:$0xff]  ;;  %v1580_v17 = vpack.c.bf16 %v162_v10, %v158_v8  ;;  %v1386_v18 = vpack.c.bf16 %v169_v12, %v165_v11  ;;  %v170_v23 = vld [vmem:[%s3256_s1 + $0x470] sm:$0xff]  ;;  %v173_v24 = vld [vmem:[%s3256_s1 + $0x488] sm:$0xff] }
  0x31   :  { %v1582_v22 = vpack.c.bf16 %v171_v14, %v167_v13  ;;  %v175_v26 = vld [vmem:[%s3256_s1 + $0x498] sm:$0xff]  ;;  %v178_v35 = vld [vmem:[%s3256_s1 + $0x4b0] sm:$0xff]  ;;  %v181_v36 = vld [vmem:[%s3256_s1 + $0x4c8] sm:$0xff] }
  0x32   :  { %1365 = vmatpush1.bf16.msra.mxu0 %v1364_v19  ;;  %v164_v19 = vld [vmem:[%s3256_s1 + $0x440] sm:$0xff]  ;;  %v179_v27 = vld [vmem:[%s3256_s1 + $0x4b8] sm:$0xff]  ;;  %v186_v47 = vld [vmem:[%s3256_s1 + $0x4f0] sm:$0xff] }
  0x33   :  { %1561 = vmatpush1.bf16.msra.mxu1 %v1560_v20  ;;  %1367 = vmatprep.subr.bf16.mxu0 %v1366_v21  ;;  %v168_v20 = vld [vmem:[%s3256_s1 + $0x460] sm:$0xff]  ;;  %v166_v21 = vld [vmem:[%s3256_s1 + $0x450] sm:$0xff]  ;;  %v1586_v34 = vpack.c.bf16 %v179_v27, %v175_v26  ;;  %v183_v38 = vld [vmem:[%s3256_s1 + $0x4d8] sm:$0xff] }
  0x34   :  { %1563 = vmatprep.subr.bf16.mxu1 %v1562_v25  ;;  %v177_v25 = vld [vmem:[%s3256_s1 + $0x4a8] sm:$0xff]  ;;  %v1388_v28 = vpack.c.bf16 %v168_v20, %v164_v19  ;;  %v1584_v29 = vpack.c.bf16 %v170_v23, %v166_v21  ;;  %v187_v39 = vld [vmem:[%s3256_s1 + $0x4f8] sm:$0xff]  ;;  %v194_v59 = vld [vmem:[%s3256_s1 + $0x530] sm:$0xff] }
  0x35   :  { %v1390_v30 = vpack.c.bf16 %v177_v25, %v173_v24  ;;  %v1590_v46 = vpack.c.bf16 %v187_v39, %v183_v38  ;;  %v189_v48 = vld [vmem:[%s3256_s1 + $0x508] sm:$0xff]  ;;  %v191_v50 = vld [vmem:[%s3256_s1 + $0x518] sm:$0xff]  ;;  %v202_v7 = vld [vmem:[%s3256_s1 + $0x570] sm:$0xff] }
  0x36   :  { %1369 = vmatpush1.bf16.msra.mxu0 %v1368_v31  ;;  %v172_v31 = vld [vmem:[%s3256_s1 + $0x480] sm:$0xff]  ;;  %v195_v51 = vld [vmem:[%s3256_s1 + $0x538] sm:$0xff]  ;;  %v197_v60 = vld [vmem:[%s3256_s1 + $0x548] sm:$0xff] }
  0x37   :  { %1565 = vmatpush1.bf16.msra.mxu1 %v1564_v32  ;;  %1371 = vmatprep.subr.bf16.mxu0 %v1370_v33  ;;  %v176_v32 = vld [vmem:[%s3256_s1 + $0x4a0] sm:$0xff]  ;;  %v174_v33 = vld [vmem:[%s3256_s1 + $0x490] sm:$0xff]  ;;  %v1594_v58 = vpack.c.bf16 %v195_v51, %v191_v50  ;;  %v199_v62 = vld [vmem:[%s3256_s1 + $0x558] sm:$0xff] }
  0x38   :  { %1567 = vmatprep.subr.bf16.mxu1 %v1566_v37  ;;  %v185_v37 = vld [vmem:[%s3256_s1 + $0x4e8] sm:$0xff]  ;;  %v1392_v40 = vpack.c.bf16 %v176_v32, %v172_v31  ;;  %v1588_v41 = vpack.c.bf16 %v178_v35, %v174_v33  ;;  %v203_v63 = vld [vmem:[%s3256_s1 + $0x578] sm:$0xff]  ;;  %v204_v13 = vld [vmem:[%s3256_s1 + $0x580] sm:$0xff] }
  0x39   :  { %v1394_v42 = vpack.c.bf16 %v185_v37, %v181_v36  ;;  %v1598_v6 = vpack.c.bf16 %v203_v63, %v199_v62  ;;  %v205_v8 = vld [vmem:[%s3256_s1 + $0x588] sm:$0xff]  ;;  %v207_v10 = vld [vmem:[%s3256_s1 + $0x598] sm:$0xff]  ;;  %v218_v32 = vld [vmem:[%s3256_s1 + $0x5f0] sm:$0xff] }
  0x3a   :  { %1373 = vmatpush1.bf16.msra.mxu0 %v1372_v43  ;;  %v180_v43 = vld [vmem:[%s3256_s1 + $0x4c0] sm:$0xff]  ;;  %v211_v11 = vld [vmem:[%s3256_s1 + $0x5b8] sm:$0xff]  ;;  %v213_v20 = vld [vmem:[%s3256_s1 + $0x5c8] sm:$0xff] }
  0x3b   :  { %1569 = vmatpush1.bf16.msra.mxu1 %v1568_v44  ;;  %1375 = vmatprep.subr.bf16.mxu0 %v1374_v45  ;;  %v184_v44 = vld [vmem:[%s3256_s1 + $0x4e0] sm:$0xff]  ;;  %v182_v45 = vld [vmem:[%s3256_s1 + $0x4d0] sm:$0xff]  ;;  %v1602_v19 = vpack.c.bf16 %v211_v11, %v207_v10  ;;  %v217_v21 = vld [vmem:[%s3256_s1 + $0x5e8] sm:$0xff] }
  0x3c   :  { %1571 = vmatprep.subr.bf16.mxu1 %v1570_v49  ;;  %v193_v49 = vld [vmem:[%s3256_s1 + $0x528] sm:$0xff]  ;;  %v1396_v52 = vpack.c.bf16 %v184_v44, %v180_v43  ;;  %v1592_v53 = vpack.c.bf16 %v186_v47, %v182_v45  ;;  %v215_v23 = vld [vmem:[%s3256_s1 + $0x5d8] sm:$0xff]  ;;  %v1410_v27 = vpack.c.bf16 %v217_v21, %v213_v20  ;;  %v226_v44 = vld [vmem:[%s3256_s1 + $0x630] sm:$0xff] }
  0x3d   :  { %v1398_v54 = vpack.c.bf16 %v193_v49, %v189_v48  ;;  %v219_v24 = vld [vmem:[%s3256_s1 + $0x5f8] sm:$0xff]  ;;  %v221_v33 = vld [vmem:[%s3256_s1 + $0x608] sm:$0xff] }
  0x3e   :  { %1377 = vmatpush1.bf16.msra.mxu0 %v1376_v55  ;;  %v188_v55 = vld [vmem:[%s3256_s1 + $0x500] sm:$0xff]  ;;  %v1606_v31 = vpack.c.bf16 %v219_v24, %v215_v23  ;;  %v223_v35 = vld [vmem:[%s3256_s1 + $0x618] sm:$0xff]  ;;  %v229_v45 = vld [vmem:[%s3256_s1 + $0x648] sm:$0xff] }
  0x3f   :  { %1573 = vmatpush1.bf16.msra.mxu1 %v1572_v56  ;;  %1379 = vmatprep.subr.bf16.mxu0 %v1378_v57  ;;  %v192_v56 = vld [vmem:[%s3256_s1 + $0x520] sm:$0xff]  ;;  %v190_v57 = vld [vmem:[%s3256_s1 + $0x510] sm:$0xff]  ;;  %v227_v36 = vld [vmem:[%s3256_s1 + $0x638] sm:$0xff] }
  0x40   :  { %1575 = vmatprep.subr.bf16.mxu1 %v1574_v61  ;;  %v201_v61 = vld [vmem:[%s3256_s1 + $0x568] sm:$0xff]  ;;  %v1400_v0 = vpack.c.bf16 %v192_v56, %v188_v55  ;;  %v1596_v1 = vpack.c.bf16 %v194_v59, %v190_v57  ;;  %v1610_v43 = vpack.c.bf16 %v227_v36, %v223_v35  ;;  %v231_v47 = vld [vmem:[%s3256_s1 + $0x658] sm:$0xff]  ;;  %v234_v56 = vld [vmem:[%s3256_s1 + $0x670] sm:$0xff] }
  0x41   :  { %v1402_v2 = vpack.c.bf16 %v201_v61, %v197_v60  ;;  %v235_v48 = vld [vmem:[%s3256_s1 + $0x678] sm:$0xff]  ;;  %v237_v57 = vld [vmem:[%s3256_s1 + $0x688] sm:$0xff]  ;;  %v252_v24 = vld [vmem:[%s3256_s1 + $0x700] sm:$0xff] }
  0x42   :  { %1381 = vmatpush1.bf16.msra.mxu0 %v1380_v3  ;;  %v196_v3 = vld [vmem:[%s3256_s1 + $0x540] sm:$0xff]  ;;  %v1614_v55 = vpack.c.bf16 %v235_v48, %v231_v47  ;;  %v239_v59 = vld [vmem:[%s3256_s1 + $0x698] sm:$0xff] }
  0x43   :  { %1577 = vmatpush1.bf16.msra.mxu1 %v1576_v4  ;;  %1383 = vmatprep.subr.bf16.mxu0 %v1382_v5  ;;  %v200_v4 = vld [vmem:[%s3256_s1 + $0x560] sm:$0xff]  ;;  %v198_v5 = vld [vmem:[%s3256_s1 + $0x550] sm:$0xff]  ;;  %v243_v60 = vld [vmem:[%s3256_s1 + $0x6b8] sm:$0xff] }
  0x44   :  { %1579 = vmatprep.subr.bf16.mxu1 %v1578_v9  ;;  %v209_v9 = vld [vmem:[%s3256_s1 + $0x5a8] sm:$0xff]  ;;  %v1404_v12 = vpack.c.bf16 %v200_v4, %v196_v3  ;;  %v1600_v14 = vpack.c.bf16 %v202_v7, %v198_v5  ;;  %v1618_v3 = vpack.c.bf16 %v243_v60, %v239_v59  ;;  %v242_v4 = vld [vmem:[%s3256_s1 + $0x6b0] sm:$0xff]  ;;  %v247_v7 = vld [vmem:[%s3256_s1 + $0x6d8] sm:$0xff] }
  0x45   :  { %511 = vmatmul.mubr.f32.vlgmr.msra.gmra.mrb[0].mxu0 %v21_v15  ;;  %v245_v5 = vld [vmem:[%s3256_s1 + $0x6c8] sm:$0xff]  ;;  %v259_v20 = vld [vmem:[%s3256_s1 + $0x738] sm:$0xff]  ;;  %v260_v36 = vld [vmem:[%s3256_s1 + $0x740] sm:$0xff] }
  0x46   :  { %1385 = vmatpush1.bf16.msra.mxu0 %v1384_v16  ;;  %795 = vmatmul.mubr.f32.vlgmr.msra.gmra.mrb[0].mxu1 %v21_v15  ;;  %v1406_v15 = vpack.c.bf16 %v209_v9, %v205_v8  ;;  %v208_v16 = vld [vmem:[%s3256_s1 + $0x5a0] sm:$0xff]  ;;  %v251_v8 = vld [vmem:[%s3256_s1 + $0x6f8] sm:$0xff] }
  0x47   :  { %1581 = vmatpush1.bf16.msra.mxu1 %v1580_v17  ;;  %1387 = vmatprep.subr.bf16.mxu0 %v1386_v18  ;;  %v206_v17 = vld [vmem:[%s3256_s1 + $0x590] sm:$0xff]  ;;  %v1408_v25 = vpack.c.bf16 %v208_v16, %v204_v13  ;;  %v248_v13 = vld [vmem:[%s3256_s1 + $0x6e0] sm:$0xff] }
  0x48   :  { %1583 = vmatprep.subr.bf16.mxu1 %v1582_v22  ;;  %v210_v18 = vld [vmem:[%s3256_s1 + $0x5b0] sm:$0xff]  ;;  %v24_v22 = vld [vmem:[%s3255_s0 + $0x18] sm:$0xff]  ;;  %v268_v48 = vld [vmem:[%s3256_s1 + $0x780] sm:$0xff] }
  0x49   :  { %581 = vmatprep.mubr.f32.mxu0 %v24_v22  ;;  %865 = vmatprep.mubr.f32.mxu1 %v24_v22  ;;  %v1604_v26 = vpack.c.bf16 %v210_v18, %v206_v17  ;;  %v250_v16 = vld [vmem:[%s3256_s1 + $0x6f0] sm:$0xff]  ;;  %v253_v17 = vld [vmem:[%s3256_s1 + $0x708] sm:$0xff]  ;;  %v276_v60 = vld [vmem:[%s3256_s1 + $0x7c0] sm:$0xff] }
  0x4a   :  { %1389 = vmatpush1.bf16.msra.mxu0 %v1388_v28  ;;  %v212_v28 = vld [vmem:[%s3256_s1 + $0x5c0] sm:$0xff]  ;;  %v257_v18 = vld [vmem:[%s3256_s1 + $0x728] sm:$0xff] }
  0x4b   :  { %1585 = vmatpush1.bf16.msra.mxu1 %v1584_v29  ;;  %1391 = vmatprep.subr.bf16.mxu0 %v1390_v30  ;;  %v216_v29 = vld [vmem:[%s3256_s1 + $0x5e0] sm:$0xff]  ;;  %v214_v30 = vld [vmem:[%s3256_s1 + $0x5d0] sm:$0xff]  ;;  %v1430_v23 = vpack.c.bf16 %v257_v18, %v253_v17 }
  0x4c   :  { %1587 = vmatprep.subr.bf16.mxu1 %v1586_v34  ;;  %v225_v34 = vld [vmem:[%s3256_s1 + $0x628] sm:$0xff]  ;;  %v1412_v37 = vpack.c.bf16 %v216_v29, %v212_v28  ;;  %v1608_v38 = vpack.c.bf16 %v218_v32, %v214_v30  ;;  %v258_v28 = vld [vmem:[%s3256_s1 + $0x730] sm:$0xff]  ;;  %v267_v32 = vld [vmem:[%s3256_s1 + $0x778] sm:$0xff] }
  0x4d   :  { %v1414_v39 = vpack.c.bf16 %v225_v34, %v221_v33  ;;  %v261_v29 = vld [vmem:[%s3256_s1 + $0x748] sm:$0xff]  ;;  %v23_v17 = vld [vmem:[%s3255_s0 + $0x10] sm:$0xff] }
  0x4e   :  { %1393 = vmatpush1.bf16.msra.mxu0 %v1392_v40  ;;  %v220_v40 = vld [vmem:[%s3256_s1 + $0x600] sm:$0xff]  ;;  %v265_v30 = vld [vmem:[%s3256_s1 + $0x768] sm:$0xff] }
  0x4f   :  { %1589 = vmatpush1.bf16.msra.mxu1 %v1588_v41  ;;  %1395 = vmatprep.subr.bf16.mxu0 %v1394_v42  ;;  %v224_v41 = vld [vmem:[%s3256_s1 + $0x620] sm:$0xff]  ;;  %v222_v42 = vld [vmem:[%s3256_s1 + $0x610] sm:$0xff]  ;;  %v1434_v35 = vpack.c.bf16 %v265_v30, %v261_v29  ;;  %v307_v29 = vld [vmem:[%s3256_s1 + $0x8b8] sm:$0xff] }
  0x50   :  { %1591 = vmatprep.subr.bf16.mxu1 %v1590_v46  ;;  %v233_v46 = vld [vmem:[%s3256_s1 + $0x668] sm:$0xff]  ;;  %v1416_v49 = vpack.c.bf16 %v224_v41, %v220_v40  ;;  %v1612_v50 = vpack.c.bf16 %v226_v44, %v222_v42  ;;  %v266_v40 = vld [vmem:[%s3256_s1 + $0x770] sm:$0xff]  ;;  %v275_v44 = vld [vmem:[%s3256_s1 + $0x7b8] sm:$0xff] }
  0x51   :  { %v1418_v51 = vpack.c.bf16 %v233_v46, %v229_v45  ;;  %v269_v41 = vld [vmem:[%s3256_s1 + $0x788] sm:$0xff] }
  0x52   :  { %1397 = vmatpush1.bf16.msra.mxu0 %v1396_v52  ;;  %v228_v52 = vld [vmem:[%s3256_s1 + $0x640] sm:$0xff]  ;;  %v273_v42 = vld [vmem:[%s3256_s1 + $0x7a8] sm:$0xff] }
  0x53   :  { %1593 = vmatpush1.bf16.msra.mxu1 %v1592_v53  ;;  %1399 = vmatprep.subr.bf16.mxu0 %v1398_v54  ;;  %v232_v53 = vld [vmem:[%s3256_s1 + $0x660] sm:$0xff]  ;;  %v230_v54 = vld [vmem:[%s3256_s1 + $0x650] sm:$0xff]  ;;  %v1438_v47 = vpack.c.bf16 %v273_v42, %v269_v41  ;;  %v26_v30 = vld [vmem:[%s3255_s0 + $0x28] sm:$0xff] }
  0x54   :  { %1595 = vmatprep.subr.bf16.mxu1 %v1594_v58  ;;  %v241_v58 = vld [vmem:[%s3256_s1 + $0x6a8] sm:$0xff]  ;;  %v1420_v61 = vpack.c.bf16 %v232_v53, %v228_v52  ;;  %v1616_v62 = vpack.c.bf16 %v234_v56, %v230_v54  ;;  %v274_v52 = vld [vmem:[%s3256_s1 + $0x7b0] sm:$0xff]  ;;  %v283_v56 = vld [vmem:[%s3256_s1 + $0x7f8] sm:$0xff] }
  0x55   :  { %v1422_v63 = vpack.c.bf16 %v241_v58, %v237_v57  ;;  %v277_v53 = vld [vmem:[%s3256_s1 + $0x7c8] sm:$0xff]  ;;  %v311_v41 = vld [vmem:[%s3256_s1 + $0x8d8] sm:$0xff] }
  0x56   :  { %1401 = vmatpush1.bf16.msra.mxu0 %v1400_v0  ;;  %v236_v0 = vld [vmem:[%s3256_s1 + $0x680] sm:$0xff]  ;;  %v281_v54 = vld [vmem:[%s3256_s1 + $0x7e8] sm:$0xff]  ;;  %v315_v42 = vld [vmem:[%s3256_s1 + $0x8f8] sm:$0xff] }
  0x57   :  { %1597 = vmatpush1.bf16.msra.mxu1 %v1596_v1  ;;  %1403 = vmatprep.subr.bf16.mxu0 %v1402_v2  ;;  %v240_v1 = vld [vmem:[%s3256_s1 + $0x6a0] sm:$0xff]  ;;  %v238_v2 = vld [vmem:[%s3256_s1 + $0x690] sm:$0xff]  ;;  %v1442_v59 = vpack.c.bf16 %v281_v54, %v277_v53  ;;  %v319_v53 = vld [vmem:[%s3256_s1 + $0x918] sm:$0xff] }
  0x58   :  { %1599 = vmatprep.subr.bf16.mxu1 %v1598_v6  ;;  %v249_v6 = vld [vmem:[%s3256_s1 + $0x6e8] sm:$0xff]  ;;  %v1424_v9 = vpack.c.bf16 %v240_v1, %v236_v0  ;;  %v1620_v10 = vpack.c.bf16 %v242_v4, %v238_v2  ;;  %v282_v0 = vld [vmem:[%s3256_s1 + $0x7f0] sm:$0xff]  ;;  %v291_v4 = vld [vmem:[%s3256_s1 + $0x838] sm:$0xff] }
  0x59   :  { %v1426_v11 = vpack.c.bf16 %v249_v6, %v245_v5  ;;  %v285_v1 = vld [vmem:[%s3256_s1 + $0x808] sm:$0xff]  ;;  %v323_v54 = vld [vmem:[%s3256_s1 + $0x938] sm:$0xff] }
  0x5a   :  { %1405 = vmatpush1.bf16.msra.mxu0 %v1404_v12  ;;  %v244_v12 = vld [vmem:[%s3256_s1 + $0x6c0] sm:$0xff]  ;;  %v289_v2 = vld [vmem:[%s3256_s1 + $0x828] sm:$0xff] }
  0x5b   :  { %1601 = vmatpush1.bf16.msra.mxu1 %v1600_v14  ;;  %1407 = vmatprep.subr.bf16.mxu0 %v1406_v15  ;;  %v246_v14 = vld [vmem:[%s3256_s1 + $0x6d0] sm:$0xff]  ;;  %v1622_v15 = vpack.c.bf16 %v251_v8, %v247_v7  ;;  %v1428_v21 = vpack.c.bf16 %v248_v13, %v244_v12  ;;  %v1446_v7 = vpack.c.bf16 %v289_v2, %v285_v1  ;;  %v284_v8 = vld [vmem:[%s3256_s1 + $0x800] sm:$0xff]  ;;  %v293_v13 = vld [vmem:[%s3256_s1 + $0x848] sm:$0xff] }
  0x5c   :  { %1603 = vmatprep.subr.bf16.mxu1 %v1602_v19  ;;  %v255_v19 = vld [vmem:[%s3256_s1 + $0x718] sm:$0xff]  ;;  %v1624_v22 = vpack.c.bf16 %v250_v16, %v246_v14  ;;  %v290_v12 = vld [vmem:[%s3256_s1 + $0x830] sm:$0xff]  ;;  %v297_v14 = vld [vmem:[%s3256_s1 + $0x868] sm:$0xff] }
  0x5d   :  { %v299_v16 = vld [vmem:[%s3256_s1 + $0x878] sm:$0xff] }
  0x5e   :  { %1409 = vmatpush1.bf16.msra.mxu0 %v1408_v25  ;;  %v256_v25 = vld [vmem:[%s3256_s1 + $0x720] sm:$0xff]  ;;  %v327_v1 = vld [vmem:[%s3256_s1 + $0x958] sm:$0xff] }
  0x5f   :  { %1605 = vmatpush1.bf16.msra.mxu1 %v1604_v26  ;;  %1411 = vmatprep.subr.bf16.mxu0 %v1410_v27  ;;  %v254_v26 = vld [vmem:[%s3256_s1 + $0x710] sm:$0xff]  ;;  %v1626_v27 = vpack.c.bf16 %v259_v20, %v255_v19  ;;  %v1432_v33 = vpack.c.bf16 %v256_v25, %v252_v24  ;;  %v1450_v20 = vpack.c.bf16 %v297_v14, %v293_v13  ;;  %v331_v2 = vld [vmem:[%s3256_s1 + $0x978] sm:$0xff] }
  0x60   :  { %1607 = vmatprep.subr.bf16.mxu1 %v1606_v31  ;;  %v263_v31 = vld [vmem:[%s3256_s1 + $0x758] sm:$0xff]  ;;  %v1628_v34 = vpack.c.bf16 %v258_v28, %v254_v26  ;;  %v298_v25 = vld [vmem:[%s3256_s1 + $0x870] sm:$0xff]  ;;  %v301_v26 = vld [vmem:[%s3256_s1 + $0x888] sm:$0xff] }
  0x61   :  { %v303_v28 = vld [vmem:[%s3256_s1 + $0x898] sm:$0xff] }
  0x62   :  { %1413 = vmatpush1.bf16.msra.mxu0 %v1412_v37  ;;  %v264_v37 = vld [vmem:[%s3256_s1 + $0x760] sm:$0xff]  ;;  %v335_v13 = vld [vmem:[%s3256_s1 + $0x998] sm:$0xff] }
  0x63   :  { %1609 = vmatpush1.bf16.msra.mxu1 %v1608_v38  ;;  %1415 = vmatprep.subr.bf16.mxu0 %v1414_v39  ;;  %v262_v38 = vld [vmem:[%s3256_s1 + $0x750] sm:$0xff]  ;;  %v1630_v39 = vpack.c.bf16 %v267_v32, %v263_v31  ;;  %v1436_v45 = vpack.c.bf16 %v264_v37, %v260_v36  ;;  %v1650_v37 = vpack.c.bf16 %v307_v29, %v303_v28  ;;  %v339_v14 = vld [vmem:[%s3256_s1 + $0x9b8] sm:$0xff] }
  0x64   :  { %1611 = vmatprep.subr.bf16.mxu1 %v1610_v43  ;;  %v271_v43 = vld [vmem:[%s3256_s1 + $0x798] sm:$0xff]  ;;  %v1632_v46 = vpack.c.bf16 %v266_v40, %v262_v38  ;;  %v302_v36 = vld [vmem:[%s3256_s1 + $0x890] sm:$0xff]  ;;  %v313_v40 = vld [vmem:[%s3256_s1 + $0x8e8] sm:$0xff] }
  0x65   :  { %v306_v38 = vld [vmem:[%s3256_s1 + $0x8b0] sm:$0xff] }
  0x66   :  { %1417 = vmatpush1.bf16.msra.mxu0 %v1416_v49  ;;  %v272_v49 = vld [vmem:[%s3256_s1 + $0x7a0] sm:$0xff] }
  0x67   :  { %1613 = vmatpush1.bf16.msra.mxu1 %v1612_v50  ;;  %1419 = vmatprep.subr.bf16.mxu0 %v1418_v51  ;;  %v270_v50 = vld [vmem:[%s3256_s1 + $0x790] sm:$0xff]  ;;  %v1634_v51 = vpack.c.bf16 %v275_v44, %v271_v43  ;;  %v1440_v57 = vpack.c.bf16 %v272_v49, %v268_v48  ;;  %v1652_v44 = vpack.c.bf16 %v306_v38, %v302_v36 }
  0x68   :  { %1615 = vmatprep.subr.bf16.mxu1 %v1614_v55  ;;  %v279_v55 = vld [vmem:[%s3256_s1 + $0x7d8] sm:$0xff]  ;;  %v1636_v58 = vpack.c.bf16 %v274_v52, %v270_v50  ;;  %v310_v48 = vld [vmem:[%s3256_s1 + $0x8d0] sm:$0xff]  ;;  %v1654_v49 = vpack.c.bf16 %v315_v42, %v311_v41  ;;  %v321_v52 = vld [vmem:[%s3256_s1 + $0x928] sm:$0xff] }
  0x69   :  { %v314_v50 = vld [vmem:[%s3256_s1 + $0x8f0] sm:$0xff] }
  0x6a   :  { %1421 = vmatpush1.bf16.msra.mxu0 %v1420_v61  ;;  %v280_v61 = vld [vmem:[%s3256_s1 + $0x7e0] sm:$0xff] }
  0x6b   :  { %1617 = vmatpush1.bf16.msra.mxu1 %v1616_v62  ;;  %1423 = vmatprep.subr.bf16.mxu0 %v1422_v63  ;;  %v278_v62 = vld [vmem:[%s3256_s1 + $0x7d0] sm:$0xff]  ;;  %v1638_v63 = vpack.c.bf16 %v283_v56, %v279_v55  ;;  %v1444_v5 = vpack.c.bf16 %v280_v61, %v276_v60  ;;  %v1656_v56 = vpack.c.bf16 %v314_v50, %v310_v48 }
  0x6c   :  { %1619 = vmatprep.subr.bf16.mxu1 %v1618_v3  ;;  %v287_v3 = vld [vmem:[%s3256_s1 + $0x818] sm:$0xff]  ;;  %v1640_v6 = vpack.c.bf16 %v282_v0, %v278_v62  ;;  %v318_v60 = vld [vmem:[%s3256_s1 + $0x910] sm:$0xff]  ;;  %v1658_v61 = vpack.c.bf16 %v323_v54, %v319_v53  ;;  %v329_v0 = vld [vmem:[%s3256_s1 + $0x968] sm:$0xff] }
  0x6d   :  { %v322_v62 = vld [vmem:[%s3256_s1 + $0x930] sm:$0xff] }
  0x6e   :  { %1425 = vmatpush1.bf16.msra.mxu0 %v1424_v9  ;;  %v288_v9 = vld [vmem:[%s3256_s1 + $0x820] sm:$0xff] }
  0x6f   :  { %1621 = vmatpush1.bf16.msra.mxu1 %v1620_v10  ;;  %1427 = vmatprep.subr.bf16.mxu0 %v1426_v11  ;;  %v286_v10 = vld [vmem:[%s3256_s1 + $0x810] sm:$0xff]  ;;  %v1642_v11 = vpack.c.bf16 %v291_v4, %v287_v3  ;;  %v1448_v18 = vpack.c.bf16 %v288_v9, %v284_v8  ;;  %v1660_v4 = vpack.c.bf16 %v322_v62, %v318_v60 }
  0x70   :  { %1623 = vmatprep.subr.bf16.mxu1 %v1622_v15  ;;  %v295_v15 = vld [vmem:[%s3256_s1 + $0x858] sm:$0xff]  ;;  %v1644_v19 = vpack.c.bf16 %v290_v12, %v286_v10  ;;  %v326_v8 = vld [vmem:[%s3256_s1 + $0x950] sm:$0xff]  ;;  %v1662_v9 = vpack.c.bf16 %v331_v2, %v327_v1  ;;  %v337_v12 = vld [vmem:[%s3256_s1 + $0x9a8] sm:$0xff] }
  0x71   :  { %v1646_v24 = vpack.c.bf16 %v299_v16, %v295_v15  ;;  %v330_v10 = vld [vmem:[%s3256_s1 + $0x970] sm:$0xff]  ;;  %v332_v16 = vld [vmem:[%s3256_s1 + $0x980] sm:$0xff] }
  0x72   :  { %1429 = vmatpush1.bf16.msra.mxu0 %v1428_v21  ;;  %v292_v21 = vld [vmem:[%s3256_s1 + $0x840] sm:$0xff] }
  0x73   :  { %1625 = vmatpush1.bf16.msra.mxu1 %v1624_v22  ;;  %1431 = vmatprep.subr.bf16.mxu0 %v1430_v23  ;;  %v296_v22 = vld [vmem:[%s3256_s1 + $0x860] sm:$0xff]  ;;  %v294_v23 = vld [vmem:[%s3256_s1 + $0x850] sm:$0xff] }
  0x74   :  { %1627 = vmatprep.subr.bf16.mxu1 %v1626_v27  ;;  %v305_v27 = vld [vmem:[%s3256_s1 + $0x8a8] sm:$0xff]  ;;  %v1452_v31 = vpack.c.bf16 %v296_v22, %v292_v21  ;;  %v1648_v32 = vpack.c.bf16 %v298_v25, %v294_v23  ;;  %v338_v21 = vld [vmem:[%s3256_s1 + $0x9b0] sm:$0xff]  ;;  %v1666_v22 = vpack.c.bf16 %v339_v14, %v335_v13 }
  0x75   :  { %v341_v23 = vld [vmem:[%s3256_s1 + $0x9c8] sm:$0xff] }
  0x76   :  { %1433 = vmatpush1.bf16.msra.mxu0 %v1432_v33  ;;  %v1454_v33 = vpack.c.bf16 %v305_v27, %v301_v26 }
  0x77   :  { %1629 = vmatpush1.bf16.msra.mxu1 %v1628_v34  ;;  %1435 = vmatprep.subr.bf16.mxu0 %v1434_v35  ;;  %v300_v34 = vld [vmem:[%s3256_s1 + $0x880] sm:$0xff] }
  0x78   :  { %1631 = vmatprep.subr.bf16.mxu1 %v1630_v39  ;;  %v304_v35 = vld [vmem:[%s3256_s1 + $0x8a0] sm:$0xff]  ;;  %v309_v39 = vld [vmem:[%s3256_s1 + $0x8c8] sm:$0xff] }
  0x79   :  { %v1456_v43 = vpack.c.bf16 %v304_v35, %v300_v34 }
  0x7a   :  { %1437 = vmatpush1.bf16.msra.mxu0 %v1436_v45  ;;  %v1458_v45 = vpack.c.bf16 %v313_v40, %v309_v39 }
  0x7b   :  { %1633 = vmatpush1.bf16.msra.mxu1 %v1632_v46  ;;  %1439 = vmatprep.subr.bf16.mxu0 %v1438_v47  ;;  %v308_v46 = vld [vmem:[%s3256_s1 + $0x8c0] sm:$0xff] }
  0x7c   :  { %1635 = vmatprep.subr.bf16.mxu1 %v1634_v51  ;;  %v312_v47 = vld [vmem:[%s3256_s1 + $0x8e0] sm:$0xff]  ;;  %v317_v51 = vld [vmem:[%s3256_s1 + $0x908] sm:$0xff] }
  0x7d   :  { %v1460_v55 = vpack.c.bf16 %v312_v47, %v308_v46 }
  0x7e   :  { %1441 = vmatpush1.bf16.msra.mxu0 %v1440_v57  ;;  %v1462_v57 = vpack.c.bf16 %v321_v52, %v317_v51 }
  0x7f   :  { %1637 = vmatpush1.bf16.msra.mxu1 %v1636_v58  ;;  %1443 = vmatprep.subr.bf16.mxu0 %v1442_v59  ;;  %v316_v58 = vld [vmem:[%s3256_s1 + $0x900] sm:$0xff] }
  0x80   :  { %1639 = vmatprep.subr.bf16.mxu1 %v1638_v63  ;;  %v320_v59 = vld [vmem:[%s3256_s1 + $0x920] sm:$0xff]  ;;  %v325_v63 = vld [vmem:[%s3256_s1 + $0x948] sm:$0xff] }
  0x81   :  { %v1464_v3 = vpack.c.bf16 %v320_v59, %v316_v58 }
  0x82   :  { %1445 = vmatpush1.bf16.msra.mxu0 %v1444_v5  ;;  %v1466_v5 = vpack.c.bf16 %v329_v0, %v325_v63 }
  0x83   :  { %1641 = vmatpush1.bf16.msra.mxu1 %v1640_v6  ;;  %1447 = vmatprep.subr.bf16.mxu0 %v1446_v7  ;;  %v324_v6 = vld [vmem:[%s3256_s1 + $0x940] sm:$0xff] }
  0x84   :  { %1643 = vmatprep.subr.bf16.mxu1 %v1642_v11  ;;  %v328_v7 = vld [vmem:[%s3256_s1 + $0x960] sm:$0xff]  ;;  %v333_v11 = vld [vmem:[%s3256_s1 + $0x988] sm:$0xff] }
  0x85   :  { %582 = vmatmul.mubr.f32.vlgmr.msra.gmra.mrb[0].mxu0 %v23_v17  ;;  %v1468_v15 = vpack.c.bf16 %v328_v7, %v324_v6 }
  0x86   :  { %1449 = vmatpush1.bf16.msra.mxu0 %v1448_v18  ;;  %866 = vmatmul.mubr.f32.vlgmr.msra.gmra.mrb[0].mxu1 %v23_v17  ;;  %v1664_v17 = vpack.c.bf16 %v330_v10, %v326_v8  ;;  %v1470_v18 = vpack.c.bf16 %v337_v12, %v333_v11 }
  0x87   :  { %1645 = vmatpush1.bf16.msra.mxu1 %v1644_v19  ;;  %1451 = vmatprep.subr.bf16.mxu0 %v1450_v20  ;;  %v336_v19 = vld [vmem:[%s3256_s1 + $0x9a0] sm:$0xff]  ;;  %v334_v20 = vld [vmem:[%s3256_s1 + $0x990] sm:$0xff] }
  0x88   :  { %1647 = vmatprep.subr.bf16.mxu1 %v1646_v24  ;;  %652 = vmatprep.mubr.f32.mxu0 %v26_v30  ;;  %v345_v24 = vld [vmem:[%s3256_s1 + $0x9e8] sm:$0xff] }
  0x89   :  { %936 = vmatprep.mubr.f32.mxu1 %v26_v30 }
  0x8a   :  { %1453 = vmatpush1.bf16.msra.mxu0 %v1452_v31 }
  0x8b   :  { %1649 = vmatpush1.bf16.msra.mxu1 %v1648_v32  ;;  %1455 = vmatprep.subr.bf16.mxu0 %v1454_v33 }
  0x8c   :  { %1651 = vmatprep.subr.bf16.mxu1 %v1650_v37 }
  0x8e   :  { %1457 = vmatpush1.bf16.msra.mxu0 %v1456_v43 }
  0x8f   :  { %1653 = vmatpush1.bf16.msra.mxu1 %v1652_v44  ;;  %1459 = vmatprep.subr.bf16.mxu0 %v1458_v45 }
  0x90   :  { %1655 = vmatprep.subr.bf16.mxu1 %v1654_v49 }
  0x92   :  { %1461 = vmatpush1.bf16.msra.mxu0 %v1460_v55 }
  0x93   :  { %1657 = vmatpush1.bf16.msra.mxu1 %v1656_v56  ;;  %1463 = vmatprep.subr.bf16.mxu0 %v1462_v57 }
  0x94   :  { %1659 = vmatprep.subr.bf16.mxu1 %v1658_v61 }
  0x96   :  { %1465 = vmatpush1.bf16.msra.mxu0 %v1464_v3 }
  0x97   :  { %1661 = vmatpush1.bf16.msra.mxu1 %v1660_v4  ;;  %1467 = vmatprep.subr.bf16.mxu0 %v1466_v5 }
  0x98   :  { %1663 = vmatprep.subr.bf16.mxu1 %v1662_v9 }
  0x99   :  { %10 = vsyncpa [#allocation3], 0  ;;  %v343_v25 = vld [vmem:[%s3256_s1 + $0x9d8] sm:$0xff]  ;;  %v1472_v27 = vpack.c.bf16 %v336_v19, %v332_v16  ;;  %v1668_v28 = vpack.c.bf16 %v338_v21, %v334_v20  ;;  %v1474_v29 = vpack.c.bf16 %v345_v24, %v341_v23  ;;  %v340_v30 = vld [vmem:[%s3256_s1 + $0x9c0] sm:$0xff]  ;;  %vm442_vm0 = vcmask 130048   ;;  %s1817_s12 = smov [#allocation2]  }
  0x9a   :  { %v347_v26 = vld [vmem:[%s3256_s1 + $0x9f8] sm:$0xff]  ;;  %1469 = vmatpush1.bf16.msra.mxu0 %v1468_v15  ;;  %v344_v31 = vld [vmem:[%s3256_s1 + $0x9e0] sm:$0xff]  ;;  %v342_v32 = vld [vmem:[%s3256_s1 + $0x9d0] sm:$0xff]  ;;  %s1237_s13 = sshll.u32 %s1817_s12, 4  ;;  %vm1229_vm1 = vcmask 80896   ;;  %s1238_s13 = int_to_ptr.vmem [resolvable:$true] %s1237_s13 }
  0x9b   :  { %1665 = vmatpush1.bf16.msra.mxu1 %v1664_v17  ;;  %1471 = vmatprep.subr.bf16.mxu0 %v1470_v18  ;;  %v1670_v33 = vpack.c.bf16 %v347_v26, %v343_v25  ;;  %v346_v34 = vld [vmem:[%s3256_s1 + $0x9f0] sm:$0xff]  ;;  %v349_v35 = vld [vmem:[%s3256_s1 + $0xa08] sm:$0xff]  ;;  %v351_v37 = vld [vmem:[%s3256_s1 + $0xa18] sm:$0xff]  ;;  %v1476_v39 = vpack.c.bf16 %v344_v31, %v340_v30  ;;  %s1792_s14 = scalar_lea.vmem %s1238_s13, 128  ;;  %p1797_p1 = scmp.lt.s32.totalorder %s1238_s13, %s1238_s13 }
  0x9c   :  { %1667 = vmatprep.subr.bf16.mxu1 %v1666_v22  ;;  %v353_v36 = vld [vmem:[%s3256_s1 + $0xa28] sm:$0xff]  ;;  %v355_v38 = vld [vmem:[%s3256_s1 + $0xa38] sm:$0xff]  ;;  %v1672_v40 = vpack.c.bf16 %v346_v34, %v342_v32  ;;  %v348_v42 = vld [vmem:[%s3256_s1 + $0xa00] sm:$0xff]  ;;  %p1793_p0 = scmp.ne.s32.totalorder %s1238_s13, %s1792_s14  ;;  %p1798_p2 = scmp.lt.s32.totalorder %s1792_s14, %s1792_s14 }
  0x9d   :  { %v1478_v41 = vpack.c.bf16 %v353_v36, %v349_v35  ;;  %v352_v43 = vld [vmem:[%s3256_s1 + $0xa20] sm:$0xff]  ;;  %v350_v44 = vld [vmem:[%s3256_s1 + $0xa10] sm:$0xff]  ;;  %v1674_v45 = vpack.c.bf16 %v355_v38, %v351_v37  ;;  %v357_v47 = vld [vmem:[%s3256_s1 + $0xa48] sm:$0xff] }
  0x9e   :  { %1473 = vmatpush1.bf16.msra.mxu0 %v1472_v27  ;;  %v354_v46 = vld [vmem:[%s3256_s1 + $0xa30] sm:$0xff]  ;;  %v361_v48 = vld [vmem:[%s3256_s1 + $0xa68] sm:$0xff]  ;;  %v359_v49 = vld [vmem:[%s3256_s1 + $0xa58] sm:$0xff]  ;;  %v1480_v51 = vpack.c.bf16 %v352_v43, %v348_v42  ;;  %p1799_p3 = por %p1798_p2, %p1797_p1 }
  0x9f   :  { %1669 = vmatpush1.bf16.msra.mxu1 %v1668_v28  ;;  %1475 = vmatprep.subr.bf16.mxu0 %v1474_v29  ;;  %v363_v50 = vld [vmem:[%s3256_s1 + $0xa78] sm:$0xff]  ;;  %v1676_v52 = vpack.c.bf16 %v354_v46, %v350_v44  ;;  %v1482_v53 = vpack.c.bf16 %v361_v48, %v357_v47  ;;  %v356_v54 = vld [vmem:[%s3256_s1 + $0xa40] sm:$0xff]  ;;  %v358_v56 = vld [vmem:[%s3256_s1 + $0xa50] sm:$0xff] }
  0xa0   :  { %1671 = vmatprep.subr.bf16.mxu1 %v1670_v33  ;;  %v360_v55 = vld [vmem:[%s3256_s1 + $0xa60] sm:$0xff]  ;;  %v1678_v57 = vpack.c.bf16 %v363_v50, %v359_v49  ;;  %v362_v58 = vld [vmem:[%s3256_s1 + $0xa70] sm:$0xff]  ;;  %v365_v59 = vld [vmem:[%s3256_s1 + $0xa88] sm:$0xff]  ;;  %p1800_p4 = pnand %p1799_p3, %p1793_p0 }
  0xa1   :  { %v369_v60 = vld [vmem:[%s3256_s1 + $0xaa8] sm:$0xff]  ;;  %v367_v61 = vld [vmem:[%s3256_s1 + $0xa98] sm:$0xff]  ;;  %v1484_v63 = vpack.c.bf16 %v360_v55, %v356_v54  ;;  %v1680_v0 = vpack.c.bf16 %v362_v58, %v358_v56  ;;  %v364_v2 = vld [vmem:[%s3256_s1 + $0xa80] sm:$0xff] }
  0xa2   :  { %1477 = vmatpush1.bf16.msra.mxu0 %v1476_v39  ;;  %v371_v62 = vld [vmem:[%s3256_s1 + $0xab8] sm:$0xff]  ;;  %v1486_v1 = vpack.c.bf16 %v369_v60, %v365_v59  ;;  %v368_v3 = vld [vmem:[%s3256_s1 + $0xaa0] sm:$0xff]  ;;  %v366_v4 = vld [vmem:[%s3256_s1 + $0xa90] sm:$0xff] }
  0xa3   :  { %1673 = vmatpush1.bf16.msra.mxu1 %v1672_v40  ;;  %1479 = vmatprep.subr.bf16.mxu0 %v1478_v41  ;;  %v1682_v5 = vpack.c.bf16 %v371_v62, %v367_v61  ;;  %v370_v6 = vld [vmem:[%s3256_s1 + $0xab0] sm:$0xff]  ;;  %v373_v7 = vld [vmem:[%s3256_s1 + $0xac8] sm:$0xff]  ;;  %v375_v9 = vld [vmem:[%s3256_s1 + $0xad8] sm:$0xff]  ;;  %v1488_v11 = vpack.c.bf16 %v368_v3, %v364_v2 }
  0xa4   :  { %1675 = vmatprep.subr.bf16.mxu1 %v1674_v45  ;;  %v377_v8 = vld [vmem:[%s3256_s1 + $0xae8] sm:$0xff]  ;;  %v379_v10 = vld [vmem:[%s3256_s1 + $0xaf8] sm:$0xff]  ;;  %v1684_v12 = vpack.c.bf16 %v370_v6, %v366_v4  ;;  %v372_v14 = vld [vmem:[%s3256_s1 + $0xac0] sm:$0xff] }
  0xa5   :  { %v1490_v13 = vpack.c.bf16 %v377_v8, %v373_v7  ;;  %v376_v15 = vld [vmem:[%s3256_s1 + $0xae0] sm:$0xff]  ;;  %v374_v16 = vld [vmem:[%s3256_s1 + $0xad0] sm:$0xff]  ;;  %v1686_v17 = vpack.c.bf16 %v379_v10, %v375_v9  ;;  %v381_v19 = vld [vmem:[%s3256_s1 + $0xb08] sm:$0xff] }
  0xa6   :  { %1481 = vmatpush1.bf16.msra.mxu0 %v1480_v51  ;;  %v378_v18 = vld [vmem:[%s3256_s1 + $0xaf0] sm:$0xff]  ;;  %v385_v20 = vld [vmem:[%s3256_s1 + $0xb28] sm:$0xff]  ;;  %v383_v21 = vld [vmem:[%s3256_s1 + $0xb18] sm:$0xff]  ;;  %v1492_v23 = vpack.c.bf16 %v376_v15, %v372_v14 }
  0xa7   :  { %1677 = vmatpush1.bf16.msra.mxu1 %v1676_v52  ;;  %1483 = vmatprep.subr.bf16.mxu0 %v1482_v53  ;;  %v387_v22 = vld [vmem:[%s3256_s1 + $0xb38] sm:$0xff]  ;;  %v1688_v24 = vpack.c.bf16 %v378_v18, %v374_v16  ;;  %v1494_v25 = vpack.c.bf16 %v385_v20, %v381_v19  ;;  %v380_v26 = vld [vmem:[%s3256_s1 + $0xb00] sm:$0xff]  ;;  %v382_v28 = vld [vmem:[%s3256_s1 + $0xb10] sm:$0xff] }
  0xa8   :  { %1679 = vmatprep.subr.bf16.mxu1 %v1678_v57  ;;  %v384_v27 = vld [vmem:[%s3256_s1 + $0xb20] sm:$0xff]  ;;  %v1690_v29 = vpack.c.bf16 %v387_v22, %v383_v21  ;;  %v386_v30 = vld [vmem:[%s3256_s1 + $0xb30] sm:$0xff]  ;;  %v389_v31 = vld [vmem:[%s3256_s1 + $0xb48] sm:$0xff] }
  0xa9   :  { %v393_v32 = vld [vmem:[%s3256_s1 + $0xb68] sm:$0xff]  ;;  %v391_v33 = vld [vmem:[%s3256_s1 + $0xb58] sm:$0xff]  ;;  %v1496_v35 = vpack.c.bf16 %v384_v27, %v380_v26  ;;  %v1692_v36 = vpack.c.bf16 %v386_v30, %v382_v28  ;;  %v388_v38 = vld [vmem:[%s3256_s1 + $0xb40] sm:$0xff] }
  0xaa   :  { %1485 = vmatpush1.bf16.msra.mxu0 %v1484_v63  ;;  %v395_v34 = vld [vmem:[%s3256_s1 + $0xb78] sm:$0xff]  ;;  %v1498_v37 = vpack.c.bf16 %v393_v32, %v389_v31  ;;  %v392_v39 = vld [vmem:[%s3256_s1 + $0xb60] sm:$0xff]  ;;  %v390_v40 = vld [vmem:[%s3256_s1 + $0xb50] sm:$0xff] }
  0xab   :  { %1681 = vmatpush1.bf16.msra.mxu1 %v1680_v0  ;;  %1487 = vmatprep.subr.bf16.mxu0 %v1486_v1  ;;  %v1694_v41 = vpack.c.bf16 %v395_v34, %v391_v33  ;;  %v394_v42 = vld [vmem:[%s3256_s1 + $0xb70] sm:$0xff]  ;;  %v397_v43 = vld [vmem:[%s3256_s1 + $0xb88] sm:$0xff]  ;;  %v399_v45 = vld [vmem:[%s3256_s1 + $0xb98] sm:$0xff]  ;;  %v1500_v47 = vpack.c.bf16 %v392_v39, %v388_v38 }
  0xac   :  { %1683 = vmatprep.subr.bf16.mxu1 %v1682_v5  ;;  %v401_v44 = vld [vmem:[%s3256_s1 + $0xba8] sm:$0xff]  ;;  %v403_v46 = vld [vmem:[%s3256_s1 + $0xbb8] sm:$0xff]  ;;  %v1696_v48 = vpack.c.bf16 %v394_v42, %v390_v40  ;;  %v396_v50 = vld [vmem:[%s3256_s1 + $0xb80] sm:$0xff] }
  0xad   :  { %v1502_v49 = vpack.c.bf16 %v401_v44, %v397_v43  ;;  %v400_v51 = vld [vmem:[%s3256_s1 + $0xba0] sm:$0xff]  ;;  %v398_v52 = vld [vmem:[%s3256_s1 + $0xb90] sm:$0xff]  ;;  %v1698_v53 = vpack.c.bf16 %v403_v46, %v399_v45  ;;  %v405_v55 = vld [vmem:[%s3256_s1 + $0xbc8] sm:$0xff] }
  0xae   :  { %1489 = vmatpush1.bf16.msra.mxu0 %v1488_v11  ;;  %v402_v54 = vld [vmem:[%s3256_s1 + $0xbb0] sm:$0xff]  ;;  %v409_v56 = vld [vmem:[%s3256_s1 + $0xbe8] sm:$0xff]  ;;  %v407_v57 = vld [vmem:[%s3256_s1 + $0xbd8] sm:$0xff]  ;;  %v1504_v59 = vpack.c.bf16 %v400_v51, %v396_v50 }
  0xaf   :  { %1685 = vmatpush1.bf16.msra.mxu1 %v1684_v12  ;;  %1491 = vmatprep.subr.bf16.mxu0 %v1490_v13  ;;  %v411_v58 = vld [vmem:[%s3256_s1 + $0xbf8] sm:$0xff]  ;;  %v1700_v60 = vpack.c.bf16 %v402_v54, %v398_v52  ;;  %v1506_v61 = vpack.c.bf16 %v409_v56, %v405_v55  ;;  %v404_v62 = vld [vmem:[%s3256_s1 + $0xbc0] sm:$0xff]  ;;  %v406_v0 = vld [vmem:[%s3256_s1 + $0xbd0] sm:$0xff] }
  0xb0   :  { %1687 = vmatprep.subr.bf16.mxu1 %v1686_v17  ;;  %v408_v63 = vld [vmem:[%s3256_s1 + $0xbe0] sm:$0xff]  ;;  %v1702_v1 = vpack.c.bf16 %v411_v58, %v407_v57  ;;  %v410_v2 = vld [vmem:[%s3256_s1 + $0xbf0] sm:$0xff]  ;;  %v413_v3 = vld [vmem:[%s3256_s1 + $0xc08] sm:$0xff] }
  0xb1   :  { %v417_v4 = vld [vmem:[%s3256_s1 + $0xc28] sm:$0xff]  ;;  %v415_v5 = vld [vmem:[%s3256_s1 + $0xc18] sm:$0xff]  ;;  %v1508_v7 = vpack.c.bf16 %v408_v63, %v404_v62  ;;  %v1704_v8 = vpack.c.bf16 %v410_v2, %v406_v0  ;;  %v412_v10 = vld [vmem:[%s3256_s1 + $0xc00] sm:$0xff] }
  0xb2   :  { %1493 = vmatpush1.bf16.msra.mxu0 %v1492_v23  ;;  %v419_v6 = vld [vmem:[%s3256_s1 + $0xc38] sm:$0xff]  ;;  %v1510_v9 = vpack.c.bf16 %v417_v4, %v413_v3  ;;  %v416_v11 = vld [vmem:[%s3256_s1 + $0xc20] sm:$0xff]  ;;  %v414_v13 = vld [vmem:[%s3256_s1 + $0xc10] sm:$0xff] }
  0xb3   :  { %1689 = vmatpush1.bf16.msra.mxu1 %v1688_v24  ;;  %1495 = vmatprep.subr.bf16.mxu0 %v1494_v25  ;;  %v1706_v12 = vpack.c.bf16 %v419_v6, %v415_v5  ;;  %v418_v14 = vld [vmem:[%s3256_s1 + $0xc30] sm:$0xff]  ;;  %v1034_v15 = vld [vmem:[%s3258_s3 + $0x80] sm:$0xff]  ;;  %v1035_v16 = vld [vmem:[%s3258_s3 + $0x88] sm:$0xff]  ;;  %v1512_v18 = vpack.c.bf16 %v416_v11, %v412_v10  ;;  %v1816_v24 = vmov 0.0  }
  0xb4   :  { %1691 = vmatprep.subr.bf16.mxu1 %v1690_v29  ;;  %v25_v17 = vld [vmem:[%s3255_s0 + $0x20] sm:$0xff]  ;;  %v1067_v20 = vld [vmem:[%s3258_s3 + $0x188] sm:$0xff]  ;;  %v1708_v21 = vpack.c.bf16 %v418_v14, %v414_v13  ;;  %v1710_v22 = vpack.c.bf16 %v1035_v16, %v1034_v15  ;;  %v1036_v29 = vld [vmem:[%s3258_s3 + $0x90] sm:$0xff] }
  0xb5   :  { %v1066_v19 = vld [vmem:[%s3258_s3 + $0x180] sm:$0xff]  ;;  %v1019_v26 = vld [vmem:[%s3258_s3 + $0x8] sm:$0xff]  ;;  %v1037_v30 = vld [vmem:[%s3258_s3 + $0x98] sm:$0xff] }
  0xb6   :  { %1497 = vmatpush1.bf16.msra.mxu0 %v1496_v35  ;;  %v1742_v23 = vpack.c.bf16 %v1067_v20, %v1066_v19  ;;  %v1018_v25 = vld [vmem:[%s3258_s3] sm:$0xff]  ;;  %v1051_v28 = vld [vmem:[%s3258_s3 + $0x108] sm:$0xff]  ;;  %v1068_v31 = vld [vmem:[%s3258_s3 + $0x190] sm:$0xff] }
  0xb7   :  { %1693 = vmatpush1.bf16.msra.mxu1 %v1692_v36  ;;  %1499 = vmatprep.subr.bf16.mxu0 %v1498_v37  ;;  %v1050_v27 = vld [vmem:[%s3258_s3 + $0x100] sm:$0xff]  ;;  %v1069_v32 = vld [vmem:[%s3258_s3 + $0x198] sm:$0xff]  ;;  %v27_v33 = vld [vmem:[%s3255_s0 + $0x30] sm:$0xff]  ;;  %v1712_v34 = vpack.c.bf16 %v1019_v26, %v1018_v25  ;;  %v1714_v36 = vpack.c.bf16 %v1037_v30, %v1036_v29 }
  0xb8   :  { %1695 = vmatprep.subr.bf16.mxu1 %v1694_v41  ;;  %v1744_v35 = vpack.c.bf16 %v1051_v28, %v1050_v27  ;;  %v1020_v37 = vld [vmem:[%s3258_s3 + $0x10] sm:$0xff]  ;;  %v1021_v38 = vld [vmem:[%s3258_s3 + $0x18] sm:$0xff]  ;;  %v1746_v40 = vpack.c.bf16 %v1069_v32, %v1068_v31  ;;  %v1038_v42 = vld [vmem:[%s3258_s3 + $0xa0] sm:$0xff] }
  0xb9   :  { %v1052_v39 = vld [vmem:[%s3258_s3 + $0x110] sm:$0xff]  ;;  %v1053_v41 = vld [vmem:[%s3258_s3 + $0x118] sm:$0xff]  ;;  %v1039_v43 = vld [vmem:[%s3258_s3 + $0xa8] sm:$0xff]  ;;  %v1716_v46 = vpack.c.bf16 %v1021_v38, %v1020_v37 }
  0xba   :  { %1501 = vmatpush1.bf16.msra.mxu0 %v1500_v47  ;;  %v1070_v44 = vld [vmem:[%s3258_s3 + $0x1a0] sm:$0xff]  ;;  %v1071_v45 = vld [vmem:[%s3258_s3 + $0x1a8] sm:$0xff]  ;;  %v1748_v47 = vpack.c.bf16 %v1053_v41, %v1052_v39  ;;  %v1040_v54 = vld [vmem:[%s3258_s3 + $0xb0] sm:$0xff] }
  0xbb   :  { %1697 = vmatpush1.bf16.msra.mxu1 %v1696_v48  ;;  %1503 = vmatprep.subr.bf16.mxu0 %v1502_v49  ;;  %v1718_v48 = vpack.c.bf16 %v1039_v43, %v1038_v42  ;;  %v1022_v49 = vld [vmem:[%s3258_s3 + $0x20] sm:$0xff]  ;;  %v1023_v50 = vld [vmem:[%s3258_s3 + $0x28] sm:$0xff]  ;;  %v1750_v52 = vpack.c.bf16 %v1071_v45, %v1070_v44  ;;  %v1041_v55 = vld [vmem:[%s3258_s3 + $0xb8] sm:$0xff] }
  0xbc   :  { %1699 = vmatprep.subr.bf16.mxu1 %v1698_v53  ;;  %v1054_v51 = vld [vmem:[%s3258_s3 + $0x120] sm:$0xff]  ;;  %v1055_v53 = vld [vmem:[%s3258_s3 + $0x128] sm:$0xff]  ;;  %v1072_v56 = vld [vmem:[%s3258_s3 + $0x1b0] sm:$0xff]  ;;  %v1720_v58 = vpack.c.bf16 %v1023_v50, %v1022_v49 }
  0xbd   :  { %v1073_v57 = vld [vmem:[%s3258_s3 + $0x1b8] sm:$0xff]  ;;  %v1056_v63 = vld [vmem:[%s3258_s3 + $0x130] sm:$0xff]  ;;  %v1042_v2 = vld [vmem:[%s3258_s3 + $0xc0] sm:$0xff] }
  0xbe   :  { %1505 = vmatpush1.bf16.msra.mxu0 %v1504_v59  ;;  %v1752_v59 = vpack.c.bf16 %v1055_v53, %v1054_v51  ;;  %v1025_v62 = vld [vmem:[%s3258_s3 + $0x38] sm:$0xff]  ;;  %v1754_v0 = vpack.c.bf16 %v1073_v57, %v1072_v56  ;;  %v1043_v3 = vld [vmem:[%s3258_s3 + $0xc8] sm:$0xff]  ;;  %v1074_v4 = vld [vmem:[%s3258_s3 + $0x1c0] sm:$0xff] }
  0xbf   :  { %1701 = vmatpush1.bf16.msra.mxu1 %v1700_v60  ;;  %1507 = vmatprep.subr.bf16.mxu0 %v1506_v61  ;;  %v1722_v60 = vpack.c.bf16 %v1041_v55, %v1040_v54  ;;  %v1024_v61 = vld [vmem:[%s3258_s3 + $0x30] sm:$0xff]  ;;  %v1075_v5 = vld [vmem:[%s3258_s3 + $0x1c8] sm:$0xff]  ;;  %v1058_v11 = vld [vmem:[%s3258_s3 + $0x140] sm:$0xff] }
  0xc0   :  { %1703 = vmatprep.subr.bf16.mxu1 %v1702_v1  ;;  %v1057_v1 = vld [vmem:[%s3258_s3 + $0x138] sm:$0xff]  ;;  %v1724_v6 = vpack.c.bf16 %v1025_v62, %v1024_v61  ;;  %v1027_v10 = vld [vmem:[%s3258_s3 + $0x48] sm:$0xff]  ;;  %v1044_v14 = vld [vmem:[%s3258_s3 + $0xd0] sm:$0xff] }
  0xc1   :  { %v1059_v13 = vld [vmem:[%s3258_s3 + $0x148] sm:$0xff]  ;;  %v1045_v15 = vld [vmem:[%s3258_s3 + $0xd8] sm:$0xff]  ;;  %v1076_v16 = vld [vmem:[%s3258_s3 + $0x1d0] sm:$0xff] }
  0xc2   :  { %1509 = vmatpush1.bf16.msra.mxu0 %v1508_v7  ;;  %v1756_v7 = vpack.c.bf16 %v1057_v1, %v1056_v63  ;;  %v1760_v19 = vpack.c.bf16 %v1059_v13, %v1058_v11  ;;  %v1730_v20 = vpack.c.bf16 %v1045_v15, %v1044_v14  ;;  %v1061_v25 = vld [vmem:[%s3258_s3 + $0x158] sm:$0xff]  ;;  %v1046_v26 = vld [vmem:[%s3258_s3 + $0xe0] sm:$0xff]  ;;  %v1047_v27 = vld [vmem:[%s3258_s3 + $0xe8] sm:$0xff] }
  0xc3   :  { %1705 = vmatpush1.bf16.msra.mxu1 %v1704_v8  ;;  %1511 = vmatprep.subr.bf16.mxu0 %v1510_v9  ;;  %v1726_v8 = vpack.c.bf16 %v1043_v3, %v1042_v2  ;;  %v1026_v9 = vld [vmem:[%s3258_s3 + $0x40] sm:$0xff]  ;;  %v1079_v29 = vld [vmem:[%s3258_s3 + $0x1e8] sm:$0xff]  ;;  %v1734_v32 = vpack.c.bf16 %v1047_v27, %v1046_v26  ;;  %v1049_v41 = vld [vmem:[%s3258_s3 + $0xf8] sm:$0xff] }
  0xc4   :  { %1707 = vmatprep.subr.bf16.mxu1 %v1706_v12  ;;  %v1758_v12 = vpack.c.bf16 %v1075_v5, %v1074_v4  ;;  %v1078_v28 = vld [vmem:[%s3258_s3 + $0x1e0] sm:$0xff]  ;;  %v1063_v38 = vld [vmem:[%s3258_s3 + $0x168] sm:$0xff]  ;;  %v1080_v42 = vld [vmem:[%s3258_s3 + $0x1f0] sm:$0xff] }
  0xc5   :  { %653 = vmatmul.mubr.f32.vlgmr.msra.gmra.mrb[0].mxu0 %v25_v17  ;;  %v1081_v44 = vld [vmem:[%s3258_s3 + $0x1f8] sm:$0xff]  ;;  %v1032_v45 = vld [vmem:[%s3258_s3 + $0x70] sm:$0xff]  ;;  %v420_v55 = vld [vmem:[%s3257_s2] sm:$0xf] }
  0xc6   :  { %937 = vmatmul.mubr.f32.vlgmr.msra.gmra.mrb[0].mxu1 %v25_v17  ;;  %1513 = vmatpush1.bf16.msra.mxu0 %v1512_v18  ;;  %v1077_v17 = vld [vmem:[%s3258_s3 + $0x1d8] sm:$0xff]  ;;  %v1728_v18 = vpack.c.bf16 %v1027_v10, %v1026_v9  ;;  %v1064_v49 = vld [vmem:[%s3258_s3 + $0x170] sm:$0xff]  ;;  %v1247_v13 = vld [vmem:[%s3259_s4] ss:$0 sm:$0xff] }
  0xc7   :  { %1709 = vmatpush1.bf16.msra.mxu1 %v1708_v21  ;;  %723 = vmatprep.mubr.f32.mxu0 %v1816_v24  ;;  %v1028_v21 = vld [vmem:[%s3258_s3 + $0x50] sm:$0xff]  ;;  %v1065_v50 = vld [vmem:[%s3258_s3 + $0x178] sm:$0xff] }
  0xc8   :  { %1007 = vmatprep.mubr.f32.mxu1 %v1816_v24  ;;  %1711 = vmatprep.subr.bf16.mxu0 %v1710_v22  ;;  %v1029_v22 = vld [vmem:[%s3258_s3 + $0x58] sm:$0xff]  ;;  %v1762_v24 = vpack.c.bf16 %v1077_v17, %v1076_v16  ;;  %v1772_v51 = vpack.c.bf16 %v1065_v50, %v1064_v49 }
  0xc9   :  { %1743 = vmatprep.subr.bf16.mxu1 %v1742_v23  ;;  %v1060_v23 = vld [vmem:[%s3258_s3 + $0x150] sm:$0xff]  ;;  %v1732_v30 = vpack.c.bf16 %v1029_v22, %v1028_v21 }
  0xca   :  { %v1764_v31 = vpack.c.bf16 %v1061_v25, %v1060_v23 }
  0xcd   :  { %1245 = vmatmul.mubr.msk.f32.vlgmr.msra.gmra.mrb[0].mxu0 %vm442_vm0, %v27_v33 }
  0xce   :  { %1246 = vmatmul.mubr.msk.f32.vlgmr.msra.gmra.mrb[0].mxu1 %vm442_vm0, %v27_v33  ;;  %1713 = vmatpush3.bf16.msra.mxu0 %v1712_v34  ;;  %v1766_v33 = vpack.c.bf16 %v1079_v29, %v1078_v28  ;;  %v1030_v34 = vld [vmem:[%s3258_s3 + $0x60] sm:$0xff] }
  0xcf   :  { %1745 = vmatpush3.bf16.msra.mxu1 %v1744_v35  ;;  %1715 = vmatprep.subr.bf16.mxu0 %v1714_v36  ;;  %v1031_v35 = vld [vmem:[%s3258_s3 + $0x68] sm:$0xff]  ;;  %v1062_v36 = vld [vmem:[%s3258_s3 + $0x160] sm:$0xff] }
  0xd0   :  { %1747 = vmatprep.subr.bf16.mxu1 %v1746_v40  ;;  %v1736_v37 = vpack.c.bf16 %v1031_v35, %v1030_v34  ;;  %v1768_v39 = vpack.c.bf16 %v1063_v38, %v1062_v36  ;;  %v1048_v40 = vld [vmem:[%s3258_s3 + $0xf0] sm:$0xff] }
  0xd1   :  { %v1738_v43 = vpack.c.bf16 %v1049_v41, %v1048_v40 }
  0xd2   :  { %1717 = vmatpush3.bf16.msra.mxu0 %v1716_v46  ;;  %v1033_v46 = vld [vmem:[%s3258_s3 + $0x78] sm:$0xff] }
  0xd3   :  { %1749 = vmatpush3.bf16.msra.mxu1 %v1748_v47  ;;  %1719 = vmatprep.subr.bf16.mxu0 %v1718_v48  ;;  %v1770_v47 = vpack.c.bf16 %v1081_v44, %v1080_v42  ;;  %v1740_v48 = vpack.c.bf16 %v1033_v46, %v1032_v45 }
  0xd4   :  { %1751 = vmatprep.subr.bf16.mxu1 %v1750_v52  ;;  %v422_v52 = vlaneseq }
  0xd6   :  { %1721 = vmatpush3.bf16.msra.mxu0 %v1720_v58  ;;  %v423_v53 = vshrl.u32 %v422_v52, 7 }
  0xd7   :  { %1753 = vmatpush3.bf16.msra.mxu1 %v1752_v59  ;;  %1723 = vmatprep.subr.bf16.mxu0 %v1722_v60 }
  0xd8   :  { %1755 = vmatprep.subr.bf16.mxu1 %v1754_v0  ;;  %v424_v54 = vsub.s32 0, %v423_v53  ;;  %v432_v56 = vsub.s32 2, %v423_v53  ;;  %v428_v57 = vsub.s32 1, %v423_v53  ;;  %v436_v58 = vsub.s32 3, %v423_v53 }
  0xda   :  { %1725 = vmatpush3.bf16.msra.mxu0 %v1724_v6  ;;  %v425_v59 = vrot.slane %v420_v55, %v424_v54  ;;  %v433_v60 = vrot.slane %v420_v55, %v432_v56  ;;  %v429_v61 = vrot.slane %v420_v55, %v428_v57  ;;  %v437_v62 = vrot.slane %v420_v55, %v436_v58 }
  0xdb   :  { %1757 = vmatpush3.bf16.msra.mxu1 %v1756_v7  ;;  %1727 = vmatprep.subr.bf16.mxu0 %v1726_v8 }
  0xdc   :  { %1759 = vmatprep.subr.bf16.mxu1 %v1758_v12 }
  0xde   :  { %1729 = vmatpush3.bf16.msra.mxu0 %v1728_v18 }
  0xdf   :  { %1761 = vmatpush3.bf16.msra.mxu1 %v1760_v19  ;;  %1731 = vmatprep.subr.bf16.mxu0 %v1730_v20 }
  0xe0   :  { %1763 = vmatprep.subr.bf16.mxu1 %v1762_v24 }
  0xe2   :  { %1733 = vmatpush3.bf16.msra.mxu0 %v1732_v30 }
  0xe3   :  { %1765 = vmatpush3.bf16.msra.mxu1 %v1764_v31  ;;  %1735 = vmatprep.subr.bf16.mxu0 %v1734_v32 }
  0xe4   :  { %1767 = vmatprep.subr.bf16.mxu1 %v1766_v33 }
  0xe6   :  { %1737 = vmatpush3.bf16.msra.mxu0 %v1736_v37 }
  0xe7   :  { %1769 = vmatpush3.bf16.msra.mxu1 %v1768_v39  ;;  %1739 = vmatprep.subr.bf16.mxu0 %v1738_v43 }
  0xe8   :  { %1771 = vmatprep.subr.bf16.mxu1 %v1770_v47 }
  0xea   :  { %1741 = vmatpush3.bf16.msra.mxu0 %v1740_v48 }
  0xeb   :  { %1773 = vmatpush3.bf16.msra.mxu1 %v1772_v51 }
 0x1a0   :  { %v725_v63 = vpop.f32.mrb[0].mxu0 }
 0x1a1   :  { %v1774_v0 = vadd.f32 %v725_v63, %v425_v59  ;;  %v1009_v1 = vpop.f32.mrb[0].mxu1  ;;  %v727_v2 = vpop.f32.mrb[1].mxu0 }
 0x1a2   :  { %v1776_v3 = vadd.f32 %v1009_v1, %v433_v60  ;;  %v1775_v4 = vadd.f32 %v727_v2, %v429_v61  ;;  %v1011_v5 = vpop.f32.mrb[1].mxu1 }
 0x1a3   :  { %v1777_v6 = vadd.f32 %v1011_v5, %v437_v62  ;;  %v1014_v8 = vmax.f32 %v1774_v0, 0.0 }
 0x1a4   :  { %v1015_v7 = vmax.f32 %v1775_v4, 0.0  ;;  %v1016_v10 = vmax.f32 %v1776_v3, 0.0 }
 0x1a5   :  { %v1017_v9 = vmax.f32 %v1777_v6, 0.0 }
 0x1a6   :  { %1153 = vmatprep.mubr.f32.mxu0 %v1015_v7 }
 0x1a7   :  { %1223 = vmatprep.mubr.f32.mxu1 %v1017_v9  ;;  %1154 = vmatmul.mubr.f32.vlgmr.msra.gmra.mrb[2].mxu0 %v1014_v8 }
 0x1a8   :  { %1224 = vmatmul.mubr.f32.vlgmr.msra.gmra.mrb[2].mxu1 %v1016_v10 }
 0x27a   :  { %v1280_v11 = vpop.f32.mrb[2].mxu0 }
 0x27b   :  { %v1315_v12 = vpop.f32.mrb[2].mxu1  ;;  %v1281_v14 = vpop.f32.mrb[3].mxu0 }
 0x27c   :  { %v1282_v15 = vadd.f32 %v1281_v14, %v1280_v11  ;;  %v1316_v16 = vpop.f32.mrb[3].mxu1 }
 0x27d   :  { %v1317_v17 = vadd.f32 %v1316_v16, %v1315_v12 }
 0x27e   :  { %v1156_v18 = vadd.f32 %v1282_v15, %v1247_v13 }
 0x280   :  { %v1226_v19 = vadd.f32 %v1317_v17, %v1156_v18 }
 0x282   :  { %1230 = vst.msk [vmem:[#allocation2] sm:$0xff] %vm1229_vm1, %v1226_v19 }
 0x283   :  { %1803 = shalt.err (!%p1800_p4)
}
 0x284   :  { %s1804_s16 = scalar_lea.hbm %s3260_s5, 128 }
 0x285   :  { %p1805_p5 = scmp.ne.s32.totalorder %s3260_s5, %s1804_s16  ;;  %p1808_p6 = scmp.lt.u32.totalorder %s1804_s16, %s3260_s5 }
 0x287   :  { %p1810_p7 = pnand %p1808_p6, %p1805_p5 }
 0x289   :  { %1813 = shalt.err (!%p1810_p7)
}
 0x28a   :  { %1240 = dma.vmem_to_hbm [thread:$0]  %s1238_s13, 128, %s3260_s5, [#allocation3]  }
 0x28b   :  { %1814 = dma.done.wait [#allocation3], 128  }
 0x28c   :  { %1815 = vsyncadd [#allocation3], 4294967168 }
 0x28d   :  { %1244 = vsyncpa [#allocation3], 1 }

</bundles_post_ra>
